<compile_context>
chip_gen: v7x
topology: tpu7x:2x2x1
jax: 0.10.0
libtpu: 0.0.40
codegen_flags: <defaults>
</compile_context>

<pallas_src>
import functools

import jax
import jax.numpy as jnp
from jax.experimental import pallas as pl
from jax.experimental.pallas import tpu as pltpu


# -----------------------------------------------------------------------------
# Fused Pallas kernel: bidirectional 2-layer RNN encoder + VAE head
# -----------------------------------------------------------------------------
def _seqvae_kernel(x_ref, w_ih0_ref, whh0_ref, b0_ref,
                   w_ih1_ref, whh1_ref, b1_ref,
                   wml_ref, bml_ref, noise_ref,
                   out_ref,
                   p0_scr, out0_scr, p1_scr, hid_scr,
                   *, T, B, Bp, H, L):
    f32 = jnp.float32

    def dot(a, b):
        return jnp.dot(a, b, preferred_element_type=f32)

    # ---- layer 0: one fused (T*Bp, I) @ (I, 2H) input projection for BOTH
    #      directions (+ pre-summed biases folded in), hoisted off the chain.
    p0_scr[...] = dot(x_ref[...], w_ih0_ref[...]) + b0_ref[...]

    # ---- layer 0 recurrence: fwd and bwd fused into ONE block-diagonal
    #      (2H, 2H) matmul + ONE tanh per step.  The per-step input pairs fwd
    #      time t with bwd time T-1-t and depends only on the already-computed
    #      projections, so it can be hoisted off the serial h-dependency chain.
    whh0 = whh0_ref[...]
    h_cat = jnp.zeros((Bp, 2 * H), f32)
    for t in range(T):
        tb = T - 1 - t
        step_in = jnp.concatenate(
            [p0_scr[t * Bp:(t + 1) * Bp, 0:H],
             p0_scr[tb * Bp:(tb + 1) * Bp, H:2 * H]], axis=1)
        h_cat = jnp.tanh(step_in + dot(h_cat, whh0))
        # layer-1 input: [fwd | bwd] concat along features, time-major rows.
        out0_scr[t * Bp:(t + 1) * Bp, 0:H] = h_cat[:, 0:H]
        out0_scr[tb * Bp:(tb + 1) * Bp, H:2 * H] = h_cat[:, H:2 * H]
    h0_cat = h_cat

    # ---- layer 1: one fused (T*Bp, 2H) @ (2H, 2H) input projection.
    p1_scr[...] = dot(out0_scr[...], w_ih1_ref[...]) + b1_ref[...]

    whh1 = whh1_ref[...]
    h_cat = jnp.zeros((Bp, 2 * H), f32)
    for t in range(T):
        tb = T - 1 - t
        step_in = jnp.concatenate(
            [p1_scr[t * Bp:(t + 1) * Bp, 0:H],
             p1_scr[tb * Bp:(tb + 1) * Bp, H:2 * H]], axis=1)
        h_cat = jnp.tanh(step_in + dot(h_cat, whh1))
    h1_cat = h_cat

    # ---- bug-compatible PyTorch `hidden.view(B, 4H)` (row-major flatten of the
    #      (4, B, H) stack [l0_fwd, l0_bwd, l1_fwd, l1_bwd]), real batch rows
    #      only, assembled into a lane-dense (B, 4H) scratch.  Static offsets.
    h_finals = (h0_cat[0:B, 0:H], h0_cat[0:B, H:2 * H],
                h1_cat[0:B, 0:H], h1_cat[0:B, H:2 * H])
    four_h = 4 * H
    for d, h_d in enumerate(h_finals):
        for b in range(B):
            flat = d * B * H + b * H
            r, c = flat // four_h, flat % four_h
            hid_scr[r:r + 1, c:c + H] = h_d[b:b + 1, :]

    # ---- fused VAE head: ONE (B, 4H) @ (4H, 2L) matmul for mean|logv, then
    #      the reparameterization; results packed into one lane-dense (B, 4L)
    #      output ordered [z | mean | logv | std].
    hid = hid_scr[...]
    ml = dot(hid, wml_ref[...]) + bml_ref[...]
    mean = ml[:, 0:L]
    logv = ml[:, L:2 * L]
    std = jnp.exp(0.5 * logv)
    z = noise_ref[...] * std + mean
    out_ref[...] = jnp.concatenate([z, mean, logv, std], axis=1)


# -----------------------------------------------------------------------------
# pallas_call wrapper
# -----------------------------------------------------------------------------
def _full_spec(shape):
    nd = len(shape)
    return pl.BlockSpec(shape, lambda i, nd=nd: (0,) * nd)


def seqvae_forward(x_bti, params, noise):
    """Mirrors SeqVAE.forward with decoder=False. x_bti: (batch, seq, feature)."""
    B, T, I = x_bti.shape
    H = params["w_hh0f"].shape[0]
    L = params["wm"].shape[1]
    f32 = jnp.float32

    # Pad the batch to a full sublane tile (8) so every per-step slice of the
    # time-major scratches is (8, *)-aligned.  Padded rows carry garbage and
    # never reach the head (it only reads the real B rows).
    Bp = ((B + 7) // 8) * 8
    x_tbi = jnp.transpose(x_bti, (1, 0, 2)).astype(f32)                    # (T, B, I)
    if Bp != B:
        x_tbi = jnp.pad(x_tbi, ((0, 0), (0, Bp - B), (0, 0)))
    x2d = x_tbi.reshape(T * Bp, I)                                         # time-major rows

    # Fuse fwd|bwd weights: input projections side by side, recurrent weights
    # block-diagonal (exact zeros off-diagonal), head weights mean|logv side by
    # side.  All done once in the wrapper.
    zH = jnp.zeros((H, H), f32)
    w_ih0 = jnp.concatenate([params["w_ih0f"], params["w_ih0b"]], axis=1)  # (I, 2H)
    b0 = jnp.concatenate([params["b0f"], params["b0b"]], axis=1)           # (1, 2H)
    whh0 = jnp.concatenate(
        [jnp.concatenate([params["w_hh0f"], zH], axis=1),
         jnp.concatenate([zH, params["w_hh0b"]], axis=1)], axis=0)         # (2H, 2H)
    w_ih1 = jnp.concatenate([params["w_ih1f"], params["w_ih1b"]], axis=1)  # (2H, 2H)
    b1 = jnp.concatenate([params["b1f"], params["b1b"]], axis=1)           # (1, 2H)
    whh1 = jnp.concatenate(
        [jnp.concatenate([params["w_hh1f"], zH], axis=1),
         jnp.concatenate([zH, params["w_hh1b"]], axis=1)], axis=0)         # (2H, 2H)
    wml = jnp.concatenate([params["wm"], params["wl"]], axis=1)            # (4H, 2L)
    bml = jnp.concatenate([params["bm"], params["bl"]], axis=1)            # (1, 2L)

    args = (x2d, w_ih0, whh0, b0, w_ih1, whh1, b1, wml, bml, noise.astype(f32))

    kernel = functools.partial(_seqvae_kernel, T=T, B=B, Bp=Bp, H=H, L=L)
    out = pl.pallas_call(
        kernel,
        out_shape=jax.ShapeDtypeStruct((B, 4 * L), f32),
        grid=(1,),
        in_specs=[_full_spec(a.shape) for a in args],
        out_specs=_full_spec((B, 4 * L)),
        scratch_shapes=[
            pltpu.VMEM((T * Bp, 2 * H), f32),   # layer-0 fused input projections
            pltpu.VMEM((T * Bp, 2 * H), f32),   # layer-0 [fwd|bwd] outputs
            pltpu.VMEM((T * Bp, 2 * H), f32),   # layer-1 fused input projections
            pltpu.VMEM((B, 4 * H), f32),        # bug-compatible flattened hidden
        ],
        compiler_params=pltpu.CompilerParams(
            dimension_semantics=("arbitrary",)),
    )(*args)

    z = out[:, 0 * L:1 * L]
    mean = out[:, 1 * L:2 * L]
    logv = out[:, 2 * L:3 * L]
    std = out[:, 3 * L:4 * L]
    # dist = Normal(mean, std) represented by the (mean, std) pair.
    return z, (mean, std), mean, logv


# -----------------------------------------------------------------------------
# Parameter init (deterministic, PyTorch-style uniform(-1/sqrt(H), 1/sqrt(H)))
# -----------------------------------------------------------------------------
def init_params(key, input_size, hidden_size, latent_size):
    H, I, L = hidden_size, input_size, latent_size
    hidden_factor = 4  # 2 layers * bidirectional

    def uniform(key, shape, fan):
        bound = 1.0 / jnp.sqrt(fan)
        return jax.random.uniform(key, shape, jnp.float32, -bound, bound)

    keys = iter(jax.random.split(key, 40))
    p = {}
    # RNN weights, stored transposed (in, out) so the kernel does x @ W.
    for name, in_dim in (("0f", I), ("0b", I), ("1f", 2 * H), ("1b", 2 * H)):
        p[f"w_ih{name}"] = uniform(next(keys), (in_dim, H), H)
        p[f"w_hh{name}"] = uniform(next(keys), (H, H), H)
        b_ih = uniform(next(keys), (1, H), H)
        b_hh = uniform(next(keys), (1, H), H)
        p[f"b{name}"] = b_ih + b_hh        # biases always appear summed
    # hidden2mean / hidden2logv, transposed (in, out).
    fan = H * hidden_factor
    p["wm"] = uniform(next(keys), (fan, L), fan)
    p["bm"] = uniform(next(keys), (1, L), fan)
    p["wl"] = uniform(next(keys), (fan, L), fan)
    p["bl"] = uniform(next(keys), (1, L), fan)
    return p


# -----------------------------------------------------------------------------
# Pure-JAX reference (lax.scan) for a lightweight correctness check
# -----------------------------------------------------------------------------
def _seqvae_reference(x_bti, p, noise):
    B = x_bti.shape[0]
    H = p["w_hh0f"].shape[0]
    x_tbi = jnp.transpose(x_bti, (1, 0, 2)).astype(jnp.float32)

    def run_dir(inp, w_ih, w_hh, b, reverse):
        def step(h, x_t):
            h = jnp.tanh(x_t @ w_ih + h @ w_hh + b)
            return h, h
        xs = inp[::-1] if reverse else inp
        h_last, outs = jax.lax.scan(step, jnp.zeros((B, H), jnp.float32), xs)
        if reverse:
            outs = outs[::-1]
        return h_last, outs

    h0f, o0f = run_dir(x_tbi, p["w_ih0f"], p["w_hh0f"], p["b0f"], False)
    h0b, o0b = run_dir(x_tbi, p["w_ih0b"], p["w_hh0b"], p["b0b"], True)
    inp1 = jnp.concatenate([o0f, o0b], axis=-1)          # (T, B, 2H)
    h1f, _ = run_dir(inp1, p["w_ih1f"], p["w_hh1f"], p["b1f"], False)
    h1b, _ = run_dir(inp1, p["w_ih1b"], p["w_hh1b"], p["b1b"], True)
    # Bug-compatible with PyTorch's hidden.view(batch, hidden*hidden_factor).
    hid = jnp.stack([h0f, h0b, h1f, h1b], axis=0).reshape(B, -1)
    mean = hid @ p["wm"] + p["bm"]
    logv = hid @ p["wl"] + p["bl"]
    std = jnp.exp(0.5 * logv)
    z = noise * std + mean
    return z, mean, logv, std


# -----------------------------------------------------------------------------
# Main
# -----------------------------------------------------------------------------
if __name__ == "__main__":
    B, T, I = 2, 8, 16          # batch, seq, feature
    H, L = 32, 16               # hidden_size, latent_size

    root = jax.random.PRNGKey(0)
    k_param, k_x, k_noise = jax.random.split(root, 3)

    params = init_params(k_param, input_size=I, hidden_size=H, latent_size=L)
    x = jax.random.normal(k_x, (B, T, I), jnp.float32)
    noise = jax.random.normal(k_noise, (B, L), jnp.float32)   # torch.randn(z)

    z, dist, mean, logv = seqvae_forward(x, params, noise)
    jax.block_until_ready((z, dist, mean, logv))

    assert z.shape == (B, L) and mean.shape == (B, L) and logv.shape == (B, L)

    # Lightweight numerical check against the pure-JAX reference.
    z_r, mean_r, logv_r, std_r = _seqvae_reference(x, params, noise)
    max_err = max(
        float(jnp.max(jnp.abs(a - b)))
        for a, b in ((z, z_r), (mean, mean_r), (logv, logv_r), (dist[1], std_r)))
    assert max_err < 1e-2, f"max abs error vs reference: {max_err}"

    print("KERNEL_OK")
</pallas_src>

<mosaic_0001>
module attributes {stable_mosaic.version = 11 : i64} {
  func.func @_seqvae_kernel(%arg0: i32, %arg1: memref<64x16xf32, #tpu.memory_space<vmem>>, %arg2: memref<16x64xf32, #tpu.memory_space<vmem>>, %arg3: memref<64x64xf32, #tpu.memory_space<vmem>>, %arg4: memref<1x64xf32, #tpu.memory_space<vmem>>, %arg5: memref<64x64xf32, #tpu.memory_space<vmem>>, %arg6: memref<64x64xf32, #tpu.memory_space<vmem>>, %arg7: memref<1x64xf32, #tpu.memory_space<vmem>>, %arg8: memref<128x32xf32, #tpu.memory_space<vmem>>, %arg9: memref<1x32xf32, #tpu.memory_space<vmem>>, %arg10: memref<2x16xf32, #tpu.memory_space<vmem>>, %arg11: memref<2x64xf32, #tpu.memory_space<vmem>>, %arg12: memref<64x64xf32, #tpu.memory_space<vmem>>, %arg13: memref<64x64xf32, #tpu.memory_space<vmem>>, %arg14: memref<64x64xf32, #tpu.memory_space<vmem>>, %arg15: memref<2x128xf32, #tpu.memory_space<vmem>>) attributes {dimension_semantics = [#tpu.dimension_semantics<arbitrary>], iteration_bounds = array<i64: 1>, scalar_prefetch = 0 : i64, scratch_operands = 4 : i64, tpu.core_type = #tpu.core_type<tc>, window_params = [{pipeline_mode = #tpu.pipeline_mode<synchronous>, transform_indices = @transform_0, window_bounds = array<i64: 64, 16>}, {pipeline_mode = #tpu.pipeline_mode<synchronous>, transform_indices = @transform_1, window_bounds = array<i64: 16, 64>}, {pipeline_mode = #tpu.pipeline_mode<synchronous>, transform_indices = @transform_2, window_bounds = array<i64: 64, 64>}, {pipeline_mode = #tpu.pipeline_mode<synchronous>, transform_indices = @transform_3, window_bounds = array<i64: 1, 64>}, {pipeline_mode = #tpu.pipeline_mode<synchronous>, transform_indices = @transform_4, window_bounds = array<i64: 64, 64>}, {pipeline_mode = #tpu.pipeline_mode<synchronous>, transform_indices = @transform_5, window_bounds = array<i64: 64, 64>}, {pipeline_mode = #tpu.pipeline_mode<synchronous>, transform_indices = @transform_6, window_bounds = array<i64: 1, 64>}, {pipeline_mode = #tpu.pipeline_mode<synchronous>, transform_indices = @transform_7, window_bounds = array<i64: 128, 32>}, {pipeline_mode = #tpu.pipeline_mode<synchronous>, transform_indices = @transform_8, window_bounds = array<i64: 1, 32>}, {pipeline_mode = #tpu.pipeline_mode<synchronous>, transform_indices = @transform_9, window_bounds = array<i64: 2, 16>}, {pipeline_mode = #tpu.pipeline_mode<synchronous>, transform_indices = @transform_10, window_bounds = array<i64: 2, 64>}]} {
    %c0 = arith.constant 0 : index
    %c0_0 = arith.constant 0 : index
    %0 = vector.load %arg1[%c0, %c0_0] : memref<64x16xf32, #tpu.memory_space<vmem>>, vector<64x16xf32>
    %c0_1 = arith.constant 0 : index
    %c0_2 = arith.constant 0 : index
    %1 = vector.load %arg2[%c0_1, %c0_2] : memref<16x64xf32, #tpu.memory_space<vmem>>, vector<16x64xf32>
    %cst = arith.constant dense<0.000000e+00> : vector<64x64xf32>
    %2 = tpu.matmul %0, %1, %cst {dimension_numbers = #tpu.dot_dimension_numbers<[1], [0], [0], [1], [0, 0, 1, 1], [], []>} : vector<64x16xf32>, vector<16x64xf32>, vector<64x64xf32> -> vector<64x64xf32>
    %c0_3 = arith.constant 0 : index
    %c0_4 = arith.constant 0 : index
    %3 = vector.load %arg4[%c0_3, %c0_4] : memref<1x64xf32, #tpu.memory_space<vmem>>, vector<1x64xf32>
    %4 = vector.broadcast %3 : vector<1x64xf32> to vector<64x64xf32>
    %5 = arith.addf %2, %4 : vector<64x64xf32>
    %c0_5 = arith.constant 0 : index
    %c0_6 = arith.constant 0 : index
    %6 = vector.load %arg12[%c0_5, %c0_6] : memref<64x64xf32, #tpu.memory_space<vmem>>, vector<64x64xf32>
    tpu.vector_store %arg12[%c0_5, %c0_6], %5 {strides = array<i32>} : memref<64x64xf32, #tpu.memory_space<vmem>>, vector<64x64xf32>,
    %c0_7 = arith.constant 0 : index
    %c0_8 = arith.constant 0 : index
    %7 = vector.load %arg3[%c0_7, %c0_8] : memref<64x64xf32, #tpu.memory_space<vmem>>, vector<64x64xf32>
    %cst_9 = arith.constant 0.000000e+00 : f32
    %8 = vector.broadcast %cst_9 : f32 to vector<8x64xf32>
    %c0_10 = arith.constant 0 : index
    %c0_11 = arith.constant 0 : index
    %9 = vector.load %arg12[%c0_10, %c0_11] : memref<64x64xf32, #tpu.memory_space<vmem>>, vector<8x32xf32>
    %c56 = arith.constant 56 : index
    %c32 = arith.constant 32 : index
    %10 = vector.load %arg12[%c56, %c32] : memref<64x64xf32, #tpu.memory_space<vmem>>, vector<8x32xf32>
    %11 = tpu.concatenate %9, %10 in 1 : vector<8x32xf32>, vector<8x32xf32> -> vector<8x64xf32>
    %cst_12 = arith.constant dense<0.000000e+00> : vector<8x64xf32>
    %12 = tpu.matmul %8, %7, %cst_12 {dimension_numbers = #tpu.dot_dimension_numbers<[1], [0], [0], [1], [0, 0, 1, 1], [], []>} : vector<8x64xf32>, vector<64x64xf32>, vector<8x64xf32> -> vector<8x64xf32>
    %13 = arith.addf %11, %12 : vector<8x64xf32>
    %14 = math.tanh %13 : vector<8x64xf32>
    %15 = vector.extract_strided_slice %14 {offsets = [0, 0], sizes = [8, 32], strides = [1, 1]} : vector<8x64xf32> to vector<8x32xf32>
    %c0_13 = arith.constant 0 : index
    %c0_14 = arith.constant 0 : index
    %16 = vector.load %arg13[%c0_13, %c0_14] : memref<64x64xf32, #tpu.memory_space<vmem>>, vector<8x32xf32>
    tpu.vector_store %arg13[%c0_13, %c0_14], %15 {strides = array<i32>} : memref<64x64xf32, #tpu.memory_space<vmem>>, vector<8x32xf32>,
    %17 = vector.extract_strided_slice %14 {offsets = [0, 32], sizes = [8, 32], strides = [1, 1]} : vector<8x64xf32> to vector<8x32xf32>
    %c56_15 = arith.constant 56 : index
    %c32_16 = arith.constant 32 : index
    %18 = vector.load %arg13[%c56_15, %c32_16] : memref<64x64xf32, #tpu.memory_space<vmem>>, vector<8x32xf32>
    tpu.vector_store %arg13[%c56_15, %c32_16], %17 {strides = array<i32>} : memref<64x64xf32, #tpu.memory_space<vmem>>, vector<8x32xf32>,
    %c8 = arith.constant 8 : index
    %c0_17 = arith.constant 0 : index
    %19 = vector.load %arg12[%c8, %c0_17] : memref<64x64xf32, #tpu.memory_space<vmem>>, vector<8x32xf32>
    %c48 = arith.constant 48 : index
    %c32_18 = arith.constant 32 : index
    %20 = vector.load %arg12[%c48, %c32_18] : memref<64x64xf32, #tpu.memory_space<vmem>>, vector<8x32xf32>
    %21 = tpu.concatenate %19, %20 in 1 : vector<8x32xf32>, vector<8x32xf32> -> vector<8x64xf32>
    %cst_19 = arith.constant dense<0.000000e+00> : vector<8x64xf32>
    %22 = tpu.matmul %14, %7, %cst_19 {dimension_numbers = #tpu.dot_dimension_numbers<[1], [0], [0], [1], [0, 0, 1, 1], [], []>} : vector<8x64xf32>, vector<64x64xf32>, vector<8x64xf32> -> vector<8x64xf32>
    %23 = arith.addf %21, %22 : vector<8x64xf32>
    %24 = math.tanh %23 : vector<8x64xf32>
    %25 = vector.extract_strided_slice %24 {offsets = [0, 0], sizes = [8, 32], strides = [1, 1]} : vector<8x64xf32> to vector<8x32xf32>
    %c8_20 = arith.constant 8 : index
    %c0_21 = arith.constant 0 : index
    %26 = vector.load %arg13[%c8_20, %c0_21] : memref<64x64xf32, #tpu.memory_space<vmem>>, vector<8x32xf32>
    tpu.vector_store %arg13[%c8_20, %c0_21], %25 {strides = array<i32>} : memref<64x64xf32, #tpu.memory_space<vmem>>, vector<8x32xf32>,
    %27 = vector.extract_strided_slice %24 {offsets = [0, 32], sizes = [8, 32], strides = [1, 1]} : vector<8x64xf32> to vector<8x32xf32>
    %c48_22 = arith.constant 48 : index
    %c32_23 = arith.constant 32 : index
    %28 = vector.load %arg13[%c48_22, %c32_23] : memref<64x64xf32, #tpu.memory_space<vmem>>, vector<8x32xf32>
    tpu.vector_store %arg13[%c48_22, %c32_23], %27 {strides = array<i32>} : memref<64x64xf32, #tpu.memory_space<vmem>>, vector<8x32xf32>,
    %c16 = arith.constant 16 : index
    %c0_24 = arith.constant 0 : index
    %29 = vector.load %arg12[%c16, %c0_24] : memref<64x64xf32, #tpu.memory_space<vmem>>, vector<8x32xf32>
    %c40 = arith.constant 40 : index
    %c32_25 = arith.constant 32 : index
    %30 = vector.load %arg12[%c40, %c32_25] : memref<64x64xf32, #tpu.memory_space<vmem>>, vector<8x32xf32>
    %31 = tpu.concatenate %29, %30 in 1 : vector<8x32xf32>, vector<8x32xf32> -> vector<8x64xf32>
    %cst_26 = arith.constant dense<0.000000e+00> : vector<8x64xf32>
    %32 = tpu.matmul %24, %7, %cst_26 {dimension_numbers = #tpu.dot_dimension_numbers<[1], [0], [0], [1], [0, 0, 1, 1], [], []>} : vector<8x64xf32>, vector<64x64xf32>, vector<8x64xf32> -> vector<8x64xf32>
    %33 = arith.addf %31, %32 : vector<8x64xf32>
    %34 = math.tanh %33 : vector<8x64xf32>
    %35 = vector.extract_strided_slice %34 {offsets = [0, 0], sizes = [8, 32], strides = [1, 1]} : vector<8x64xf32> to vector<8x32xf32>
    %c16_27 = arith.constant 16 : index
    %c0_28 = arith.constant 0 : index
    %36 = vector.load %arg13[%c16_27, %c0_28] : memref<64x64xf32, #tpu.memory_space<vmem>>, vector<8x32xf32>
    tpu.vector_store %arg13[%c16_27, %c0_28], %35 {strides = array<i32>} : memref<64x64xf32, #tpu.memory_space<vmem>>, vector<8x32xf32>,
    %37 = vector.extract_strided_slice %34 {offsets = [0, 32], sizes = [8, 32], strides = [1, 1]} : vector<8x64xf32> to vector<8x32xf32>
    %c40_29 = arith.constant 40 : index
    %c32_30 = arith.constant 32 : index
    %38 = vector.load %arg13[%c40_29, %c32_30] : memref<64x64xf32, #tpu.memory_space<vmem>>, vector<8x32xf32>
    tpu.vector_store %arg13[%c40_29, %c32_30], %37 {strides = array<i32>} : memref<64x64xf32, #tpu.memory_space<vmem>>, vector<8x32xf32>,
    %c24 = arith.constant 24 : index
    %c0_31 = arith.constant 0 : index
    %39 = vector.load %arg12[%c24, %c0_31] : memref<64x64xf32, #tpu.memory_space<vmem>>, vector<8x32xf32>
    %c32_32 = arith.constant 32 : index
    %c32_33 = arith.constant 32 : index
    %40 = vector.load %arg12[%c32_32, %c32_33] : memref<64x64xf32, #tpu.memory_space<vmem>>, vector<8x32xf32>
    %41 = tpu.concatenate %39, %40 in 1 : vector<8x32xf32>, vector<8x32xf32> -> vector<8x64xf32>
    %cst_34 = arith.constant dense<0.000000e+00> : vector<8x64xf32>
    %42 = tpu.matmul %34, %7, %cst_34 {dimension_numbers = #tpu.dot_dimension_numbers<[1], [0], [0], [1], [0, 0, 1, 1], [], []>} : vector<8x64xf32>, vector<64x64xf32>, vector<8x64xf32> -> vector<8x64xf32>
    %43 = arith.addf %41, %42 : vector<8x64xf32>
    %44 = math.tanh %43 : vector<8x64xf32>
    %45 = vector.extract_strided_slice %44 {offsets = [0, 0], sizes = [8, 32], strides = [1, 1]} : vector<8x64xf32> to vector<8x32xf32>
    %c24_35 = arith.constant 24 : index
    %c0_36 = arith.constant 0 : index
    %46 = vector.load %arg13[%c24_35, %c0_36] : memref<64x64xf32, #tpu.memory_space<vmem>>, vector<8x32xf32>
    tpu.vector_store %arg13[%c24_35, %c0_36], %45 {strides = array<i32>} : memref<64x64xf32, #tpu.memory_space<vmem>>, vector<8x32xf32>,
    %47 = vector.extract_strided_slice %44 {offsets = [0, 32], sizes = [8, 32], strides = [1, 1]} : vector<8x64xf32> to vector<8x32xf32>
    %c32_37 = arith.constant 32 : index
    %c32_38 = arith.constant 32 : index
    %48 = vector.load %arg13[%c32_37, %c32_38] : memref<64x64xf32, #tpu.memory_space<vmem>>, vector<8x32xf32>
    tpu.vector_store %arg13[%c32_37, %c32_38], %47 {strides = array<i32>} : memref<64x64xf32, #tpu.memory_space<vmem>>, vector<8x32xf32>,
    %c32_39 = arith.constant 32 : index
    %c0_40 = arith.constant 0 : index
    %49 = vector.load %arg12[%c32_39, %c0_40] : memref<64x64xf32, #tpu.memory_space<vmem>>, vector<8x32xf32>
    %c24_41 = arith.constant 24 : index
    %c32_42 = arith.constant 32 : index
    %50 = vector.load %arg12[%c24_41, %c32_42] : memref<64x64xf32, #tpu.memory_space<vmem>>, vector<8x32xf32>
    %51 = tpu.concatenate %49, %50 in 1 : vector<8x32xf32>, vector<8x32xf32> -> vector<8x64xf32>
    %cst_43 = arith.constant dense<0.000000e+00> : vector<8x64xf32>
    %52 = tpu.matmul %44, %7, %cst_43 {dimension_numbers = #tpu.dot_dimension_numbers<[1], [0], [0], [1], [0, 0, 1, 1], [], []>} : vector<8x64xf32>, vector<64x64xf32>, vector<8x64xf32> -> vector<8x64xf32>
    %53 = arith.addf %51, %52 : vector<8x64xf32>
    %54 = math.tanh %53 : vector<8x64xf32>
    %55 = vector.extract_strided_slice %54 {offsets = [0, 0], sizes = [8, 32], strides = [1, 1]} : vector<8x64xf32> to vector<8x32xf32>
    %c32_44 = arith.constant 32 : index
    %c0_45 = arith.constant 0 : index
    %56 = vector.load %arg13[%c32_44, %c0_45] : memref<64x64xf32, #tpu.memory_space<vmem>>, vector<8x32xf32>
    tpu.vector_store %arg13[%c32_44, %c0_45], %55 {strides = array<i32>} : memref<64x64xf32, #tpu.memory_space<vmem>>, vector<8x32xf32>,
    %57 = vector.extract_strided_slice %54 {offsets = [0, 32], sizes = [8, 32], strides = [1, 1]} : vector<8x64xf32> to vector<8x32xf32>
    %c24_46 = arith.constant 24 : index
    %c32_47 = arith.constant 32 : index
    %58 = vector.load %arg13[%c24_46, %c32_47] : memref<64x64xf32, #tpu.memory_space<vmem>>, vector<8x32xf32>
    tpu.vector_store %arg13[%c24_46, %c32_47], %57 {strides = array<i32>} : memref<64x64xf32, #tpu.memory_space<vmem>>, vector<8x32xf32>,
    %c40_48 = arith.constant 40 : index
    %c0_49 = arith.constant 0 : index
    %59 = vector.load %arg12[%c40_48, %c0_49] : memref<64x64xf32, #tpu.memory_space<vmem>>, vector<8x32xf32>
    %c16_50 = arith.constant 16 : index
    %c32_51 = arith.constant 32 : index
    %60 = vector.load %arg12[%c16_50, %c32_51] : memref<64x64xf32, #tpu.memory_space<vmem>>, vector<8x32xf32>
    %61 = tpu.concatenate %59, %60 in 1 : vector<8x32xf32>, vector<8x32xf32> -> vector<8x64xf32>
    %cst_52 = arith.constant dense<0.000000e+00> : vector<8x64xf32>
    %62 = tpu.matmul %54, %7, %cst_52 {dimension_numbers = #tpu.dot_dimension_numbers<[1], [0], [0], [1], [0, 0, 1, 1], [], []>} : vector<8x64xf32>, vector<64x64xf32>, vector<8x64xf32> -> vector<8x64xf32>
    %63 = arith.addf %61, %62 : vector<8x64xf32>
    %64 = math.tanh %63 : vector<8x64xf32>
    %65 = vector.extract_strided_slice %64 {offsets = [0, 0], sizes = [8, 32], strides = [1, 1]} : vector<8x64xf32> to vector<8x32xf32>
    %c40_53 = arith.constant 40 : index
    %c0_54 = arith.constant 0 : index
    %66 = vector.load %arg13[%c40_53, %c0_54] : memref<64x64xf32, #tpu.memory_space<vmem>>, vector<8x32xf32>
    tpu.vector_store %arg13[%c40_53, %c0_54], %65 {strides = array<i32>} : memref<64x64xf32, #tpu.memory_space<vmem>>, vector<8x32xf32>,
    %67 = vector.extract_strided_slice %64 {offsets = [0, 32], sizes = [8, 32], strides = [1, 1]} : vector<8x64xf32> to vector<8x32xf32>
    %c16_55 = arith.constant 16 : index
    %c32_56 = arith.constant 32 : index
    %68 = vector.load %arg13[%c16_55, %c32_56] : memref<64x64xf32, #tpu.memory_space<vmem>>, vector<8x32xf32>
    tpu.vector_store %arg13[%c16_55, %c32_56], %67 {strides = array<i32>} : memref<64x64xf32, #tpu.memory_space<vmem>>, vector<8x32xf32>,
    %c48_57 = arith.constant 48 : index
    %c0_58 = arith.constant 0 : index
    %69 = vector.load %arg12[%c48_57, %c0_58] : memref<64x64xf32, #tpu.memory_space<vmem>>, vector<8x32xf32>
    %c8_59 = arith.constant 8 : index
    %c32_60 = arith.constant 32 : index
    %70 = vector.load %arg12[%c8_59, %c32_60] : memref<64x64xf32, #tpu.memory_space<vmem>>, vector<8x32xf32>
    %71 = tpu.concatenate %69, %70 in 1 : vector<8x32xf32>, vector<8x32xf32> -> vector<8x64xf32>
    %cst_61 = arith.constant dense<0.000000e+00> : vector<8x64xf32>
    %72 = tpu.matmul %64, %7, %cst_61 {dimension_numbers = #tpu.dot_dimension_numbers<[1], [0], [0], [1], [0, 0, 1, 1], [], []>} : vector<8x64xf32>, vector<64x64xf32>, vector<8x64xf32> -> vector<8x64xf32>
    %73 = arith.addf %71, %72 : vector<8x64xf32>
    %74 = math.tanh %73 : vector<8x64xf32>
    %75 = vector.extract_strided_slice %74 {offsets = [0, 0], sizes = [8, 32], strides = [1, 1]} : vector<8x64xf32> to vector<8x32xf32>
    %c48_62 = arith.constant 48 : index
    %c0_63 = arith.constant 0 : index
    %76 = vector.load %arg13[%c48_62, %c0_63] : memref<64x64xf32, #tpu.memory_space<vmem>>, vector<8x32xf32>
    tpu.vector_store %arg13[%c48_62, %c0_63], %75 {strides = array<i32>} : memref<64x64xf32, #tpu.memory_space<vmem>>, vector<8x32xf32>,
    %77 = vector.extract_strided_slice %74 {offsets = [0, 32], sizes = [8, 32], strides = [1, 1]} : vector<8x64xf32> to vector<8x32xf32>
    %c8_64 = arith.constant 8 : index
    %c32_65 = arith.constant 32 : index
    %78 = vector.load %arg13[%c8_64, %c32_65] : memref<64x64xf32, #tpu.memory_space<vmem>>, vector<8x32xf32>
    tpu.vector_store %arg13[%c8_64, %c32_65], %77 {strides = array<i32>} : memref<64x64xf32, #tpu.memory_space<vmem>>, vector<8x32xf32>,
    %c56_66 = arith.constant 56 : index
    %c0_67 = arith.constant 0 : index
    %79 = vector.load %arg12[%c56_66, %c0_67] : memref<64x64xf32, #tpu.memory_space<vmem>>, vector<8x32xf32>
    %c0_68 = arith.constant 0 : index
    %c32_69 = arith.constant 32 : index
    %80 = vector.load %arg12[%c0_68, %c32_69] : memref<64x64xf32, #tpu.memory_space<vmem>>, vector<8x32xf32>
    %81 = tpu.concatenate %79, %80 in 1 : vector<8x32xf32>, vector<8x32xf32> -> vector<8x64xf32>
    %cst_70 = arith.constant dense<0.000000e+00> : vector<8x64xf32>
    %82 = tpu.matmul %74, %7, %cst_70 {dimension_numbers = #tpu.dot_dimension_numbers<[1], [0], [0], [1], [0, 0, 1, 1], [], []>} : vector<8x64xf32>, vector<64x64xf32>, vector<8x64xf32> -> vector<8x64xf32>
    %83 = arith.addf %81, %82 : vector<8x64xf32>
    %84 = math.tanh %83 : vector<8x64xf32>
    %85 = vector.extract_strided_slice %84 {offsets = [0, 0], sizes = [8, 32], strides = [1, 1]} : vector<8x64xf32> to vector<8x32xf32>
    %c56_71 = arith.constant 56 : index
    %c0_72 = arith.constant 0 : index
    %86 = vector.load %arg13[%c56_71, %c0_72] : memref<64x64xf32, #tpu.memory_space<vmem>>, vector<8x32xf32>
    tpu.vector_store %arg13[%c56_71, %c0_72], %85 {strides = array<i32>} : memref<64x64xf32, #tpu.memory_space<vmem>>, vector<8x32xf32>,
    %87 = vector.extract_strided_slice %84 {offsets = [0, 32], sizes = [8, 32], strides = [1, 1]} : vector<8x64xf32> to vector<8x32xf32>
    %c0_73 = arith.constant 0 : index
    %c32_74 = arith.constant 32 : index
    %88 = vector.load %arg13[%c0_73, %c32_74] : memref<64x64xf32, #tpu.memory_space<vmem>>, vector<8x32xf32>
    tpu.vector_store %arg13[%c0_73, %c32_74], %87 {strides = array<i32>} : memref<64x64xf32, #tpu.memory_space<vmem>>, vector<8x32xf32>,
    %c0_75 = arith.constant 0 : index
    %c0_76 = arith.constant 0 : index
    %89 = vector.load %arg13[%c0_75, %c0_76] : memref<64x64xf32, #tpu.memory_space<vmem>>, vector<64x64xf32>
    %c0_77 = arith.constant 0 : index
    %c0_78 = arith.constant 0 : index
    %90 = vector.load %arg5[%c0_77, %c0_78] : memref<64x64xf32, #tpu.memory_space<vmem>>, vector<64x64xf32>
    %cst_79 = arith.constant dense<0.000000e+00> : vector<64x64xf32>
    %91 = tpu.matmul %89, %90, %cst_79 {dimension_numbers = #tpu.dot_dimension_numbers<[1], [0], [0], [1], [0, 0, 1, 1], [], []>} : vector<64x64xf32>, vector<64x64xf32>, vector<64x64xf32> -> vector<64x64xf32>
    %c0_80 = arith.constant 0 : index
    %c0_81 = arith.constant 0 : index
    %92 = vector.load %arg7[%c0_80, %c0_81] : memref<1x64xf32, #tpu.memory_space<vmem>>, vector<1x64xf32>
    %93 = vector.broadcast %92 : vector<1x64xf32> to vector<64x64xf32>
    %94 = arith.addf %91, %93 : vector<64x64xf32>
    %c0_82 = arith.constant 0 : index
    %c0_83 = arith.constant 0 : index
    %95 = vector.load %arg14[%c0_82, %c0_83] : memref<64x64xf32, #tpu.memory_space<vmem>>, vector<64x64xf32>
    tpu.vector_store %arg14[%c0_82, %c0_83], %94 {strides = array<i32>} : memref<64x64xf32, #tpu.memory_space<vmem>>, vector<64x64xf32>,
    %c0_84 = arith.constant 0 : index
    %c0_85 = arith.constant 0 : index
    %96 = vector.load %arg6[%c0_84, %c0_85] : memref<64x64xf32, #tpu.memory_space<vmem>>, vector<64x64xf32>
    %cst_86 = arith.constant 0.000000e+00 : f32
    %97 = vector.broadcast %cst_86 : f32 to vector<8x64xf32>
    %c0_87 = arith.constant 0 : index
    %c0_88 = arith.constant 0 : index
    %98 = vector.load %arg14[%c0_87, %c0_88] : memref<64x64xf32, #tpu.memory_space<vmem>>, vector<8x32xf32>
    %c56_89 = arith.constant 56 : index
    %c32_90 = arith.constant 32 : index
    %99 = vector.load %arg14[%c56_89, %c32_90] : memref<64x64xf32, #tpu.memory_space<vmem>>, vector<8x32xf32>
    %100 = tpu.concatenate %98, %99 in 1 : vector<8x32xf32>, vector<8x32xf32> -> vector<8x64xf32>
    %cst_91 = arith.constant dense<0.000000e+00> : vector<8x64xf32>
    %101 = tpu.matmul %97, %96, %cst_91 {dimension_numbers = #tpu.dot_dimension_numbers<[1], [0], [0], [1], [0, 0, 1, 1], [], []>} : vector<8x64xf32>, vector<64x64xf32>, vector<8x64xf32> -> vector<8x64xf32>
    %102 = arith.addf %100, %101 : vector<8x64xf32>
    %103 = math.tanh %102 : vector<8x64xf32>
    %c8_92 = arith.constant 8 : index
    %c0_93 = arith.constant 0 : index
    %104 = vector.load %arg14[%c8_92, %c0_93] : memref<64x64xf32, #tpu.memory_space<vmem>>, vector<8x32xf32>
    %c48_94 = arith.constant 48 : index
    %c32_95 = arith.constant 32 : index
    %105 = vector.load %arg14[%c48_94, %c32_95] : memref<64x64xf32, #tpu.memory_space<vmem>>, vector<8x32xf32>
    %106 = tpu.concatenate %104, %105 in 1 : vector<8x32xf32>, vector<8x32xf32> -> vector<8x64xf32>
    %cst_96 = arith.constant dense<0.000000e+00> : vector<8x64xf32>
    %107 = tpu.matmul %103, %96, %cst_96 {dimension_numbers = #tpu.dot_dimension_numbers<[1], [0], [0], [1], [0, 0, 1, 1], [], []>} : vector<8x64xf32>, vector<64x64xf32>, vector<8x64xf32> -> vector<8x64xf32>
    %108 = arith.addf %106, %107 : vector<8x64xf32>
    %109 = math.tanh %108 : vector<8x64xf32>
    %c16_97 = arith.constant 16 : index
    %c0_98 = arith.constant 0 : index
    %110 = vector.load %arg14[%c16_97, %c0_98] : memref<64x64xf32, #tpu.memory_space<vmem>>, vector<8x32xf32>
    %c40_99 = arith.constant 40 : index
    %c32_100 = arith.constant 32 : index
    %111 = vector.load %arg14[%c40_99, %c32_100] : memref<64x64xf32, #tpu.memory_space<vmem>>, vector<8x32xf32>
    %112 = tpu.concatenate %110, %111 in 1 : vector<8x32xf32>, vector<8x32xf32> -> vector<8x64xf32>
    %cst_101 = arith.constant dense<0.000000e+00> : vector<8x64xf32>
    %113 = tpu.matmul %109, %96, %cst_101 {dimension_numbers = #tpu.dot_dimension_numbers<[1], [0], [0], [1], [0, 0, 1, 1], [], []>} : vector<8x64xf32>, vector<64x64xf32>, vector<8x64xf32> -> vector<8x64xf32>
    %114 = arith.addf %112, %113 : vector<8x64xf32>
    %115 = math.tanh %114 : vector<8x64xf32>
    %c24_102 = arith.constant 24 : index
    %c0_103 = arith.constant 0 : index
    %116 = vector.load %arg14[%c24_102, %c0_103] : memref<64x64xf32, #tpu.memory_space<vmem>>, vector<8x32xf32>
    %c32_104 = arith.constant 32 : index
    %c32_105 = arith.constant 32 : index
    %117 = vector.load %arg14[%c32_104, %c32_105] : memref<64x64xf32, #tpu.memory_space<vmem>>, vector<8x32xf32>
    %118 = tpu.concatenate %116, %117 in 1 : vector<8x32xf32>, vector<8x32xf32> -> vector<8x64xf32>
    %cst_106 = arith.constant dense<0.000000e+00> : vector<8x64xf32>
    %119 = tpu.matmul %115, %96, %cst_106 {dimension_numbers = #tpu.dot_dimension_numbers<[1], [0], [0], [1], [0, 0, 1, 1], [], []>} : vector<8x64xf32>, vector<64x64xf32>, vector<8x64xf32> -> vector<8x64xf32>
    %120 = arith.addf %118, %119 : vector<8x64xf32>
    %121 = math.tanh %120 : vector<8x64xf32>
    %c32_107 = arith.constant 32 : index
    %c0_108 = arith.constant 0 : index
    %122 = vector.load %arg14[%c32_107, %c0_108] : memref<64x64xf32, #tpu.memory_space<vmem>>, vector<8x32xf32>
    %c24_109 = arith.constant 24 : index
    %c32_110 = arith.constant 32 : index
    %123 = vector.load %arg14[%c24_109, %c32_110] : memref<64x64xf32, #tpu.memory_space<vmem>>, vector<8x32xf32>
    %124 = tpu.concatenate %122, %123 in 1 : vector<8x32xf32>, vector<8x32xf32> -> vector<8x64xf32>
    %cst_111 = arith.constant dense<0.000000e+00> : vector<8x64xf32>
    %125 = tpu.matmul %121, %96, %cst_111 {dimension_numbers = #tpu.dot_dimension_numbers<[1], [0], [0], [1], [0, 0, 1, 1], [], []>} : vector<8x64xf32>, vector<64x64xf32>, vector<8x64xf32> -> vector<8x64xf32>
    %126 = arith.addf %124, %125 : vector<8x64xf32>
    %127 = math.tanh %126 : vector<8x64xf32>
    %c40_112 = arith.constant 40 : index
    %c0_113 = arith.constant 0 : index
    %128 = vector.load %arg14[%c40_112, %c0_113] : memref<64x64xf32, #tpu.memory_space<vmem>>, vector<8x32xf32>
    %c16_114 = arith.constant 16 : index
    %c32_115 = arith.constant 32 : index
    %129 = vector.load %arg14[%c16_114, %c32_115] : memref<64x64xf32, #tpu.memory_space<vmem>>, vector<8x32xf32>
    %130 = tpu.concatenate %128, %129 in 1 : vector<8x32xf32>, vector<8x32xf32> -> vector<8x64xf32>
    %cst_116 = arith.constant dense<0.000000e+00> : vector<8x64xf32>
    %131 = tpu.matmul %127, %96, %cst_116 {dimension_numbers = #tpu.dot_dimension_numbers<[1], [0], [0], [1], [0, 0, 1, 1], [], []>} : vector<8x64xf32>, vector<64x64xf32>, vector<8x64xf32> -> vector<8x64xf32>
    %132 = arith.addf %130, %131 : vector<8x64xf32>
    %133 = math.tanh %132 : vector<8x64xf32>
    %c48_117 = arith.constant 48 : index
    %c0_118 = arith.constant 0 : index
    %134 = vector.load %arg14[%c48_117, %c0_118] : memref<64x64xf32, #tpu.memory_space<vmem>>, vector<8x32xf32>
    %c8_119 = arith.constant 8 : index
    %c32_120 = arith.constant 32 : index
    %135 = vector.load %arg14[%c8_119, %c32_120] : memref<64x64xf32, #tpu.memory_space<vmem>>, vector<8x32xf32>
    %136 = tpu.concatenate %134, %135 in 1 : vector<8x32xf32>, vector<8x32xf32> -> vector<8x64xf32>
    %cst_121 = arith.constant dense<0.000000e+00> : vector<8x64xf32>
    %137 = tpu.matmul %133, %96, %cst_121 {dimension_numbers = #tpu.dot_dimension_numbers<[1], [0], [0], [1], [0, 0, 1, 1], [], []>} : vector<8x64xf32>, vector<64x64xf32>, vector<8x64xf32> -> vector<8x64xf32>
    %138 = arith.addf %136, %137 : vector<8x64xf32>
    %139 = math.tanh %138 : vector<8x64xf32>
    %c56_122 = arith.constant 56 : index
    %c0_123 = arith.constant 0 : index
    %140 = vector.load %arg14[%c56_122, %c0_123] : memref<64x64xf32, #tpu.memory_space<vmem>>, vector<8x32xf32>
    %c0_124 = arith.constant 0 : index
    %c32_125 = arith.constant 32 : index
    %141 = vector.load %arg14[%c0_124, %c32_125] : memref<64x64xf32, #tpu.memory_space<vmem>>, vector<8x32xf32>
    %142 = tpu.concatenate %140, %141 in 1 : vector<8x32xf32>, vector<8x32xf32> -> vector<8x64xf32>
    %cst_126 = arith.constant dense<0.000000e+00> : vector<8x64xf32>
    %143 = tpu.matmul %139, %96, %cst_126 {dimension_numbers = #tpu.dot_dimension_numbers<[1], [0], [0], [1], [0, 0, 1, 1], [], []>} : vector<8x64xf32>, vector<64x64xf32>, vector<8x64xf32> -> vector<8x64xf32>
    %144 = arith.addf %142, %143 : vector<8x64xf32>
    %145 = math.tanh %144 : vector<8x64xf32>
    %146 = vector.extract_strided_slice %84 {offsets = [0, 0], sizes = [2, 32], strides = [1, 1]} : vector<8x64xf32> to vector<2x32xf32>
    %147 = vector.extract_strided_slice %84 {offsets = [0, 32], sizes = [2, 32], strides = [1, 1]} : vector<8x64xf32> to vector<2x32xf32>
    %148 = vector.extract_strided_slice %145 {offsets = [0, 0], sizes = [2, 32], strides = [1, 1]} : vector<8x64xf32> to vector<2x32xf32>
    %149 = vector.extract_strided_slice %145 {offsets = [0, 32], sizes = [2, 32], strides = [1, 1]} : vector<8x64xf32> to vector<2x32xf32>
    %150 = vector.extract_strided_slice %146 {offsets = [0, 0], sizes = [1, 32], strides = [1, 1]} : vector<2x32xf32> to vector<1x32xf32>
    %c0_127 = arith.constant 0 : index
    %c0_128 = arith.constant 0 : index
    %151 = vector.load %arg15[%c0_127, %c0_128] : memref<2x128xf32, #tpu.memory_space<vmem>>, vector<1x32xf32>
    tpu.vector_store %arg15[%c0_127, %c0_128], %150 {strides = array<i32>} : memref<2x128xf32, #tpu.memory_space<vmem>>, vector<1x32xf32>,
    %152 = vector.extract_strided_slice %146 {offsets = [1, 0], sizes = [1, 32], strides = [1, 1]} : vector<2x32xf32> to vector<1x32xf32>
    %c0_129 = arith.constant 0 : index
    %c32_130 = arith.constant 32 : index
    %153 = vector.load %arg15[%c0_129, %c32_130] : memref<2x128xf32, #tpu.memory_space<vmem>>, vector<1x32xf32>
    tpu.vector_store %arg15[%c0_129, %c32_130], %152 {strides = array<i32>} : memref<2x128xf32, #tpu.memory_space<vmem>>, vector<1x32xf32>,
    %154 = vector.extract_strided_slice %147 {offsets = [0, 0], sizes = [1, 32], strides = [1, 1]} : vector<2x32xf32> to vector<1x32xf32>
    %c0_131 = arith.constant 0 : index
    %c64 = arith.constant 64 : index
    %155 = vector.load %arg15[%c0_131, %c64] : memref<2x128xf32, #tpu.memory_space<vmem>>, vector<1x32xf32>
    tpu.vector_store %arg15[%c0_131, %c64], %154 {strides = array<i32>} : memref<2x128xf32, #tpu.memory_space<vmem>>, vector<1x32xf32>,
    %156 = vector.extract_strided_slice %147 {offsets = [1, 0], sizes = [1, 32], strides = [1, 1]} : vector<2x32xf32> to vector<1x32xf32>
    %c0_132 = arith.constant 0 : index
    %c96 = arith.constant 96 : index
    %157 = vector.load %arg15[%c0_132, %c96] : memref<2x128xf32, #tpu.memory_space<vmem>>, vector<1x32xf32>
    tpu.vector_store %arg15[%c0_132, %c96], %156 {strides = array<i32>} : memref<2x128xf32, #tpu.memory_space<vmem>>, vector<1x32xf32>,
    %158 = vector.extract_strided_slice %148 {offsets = [0, 0], sizes = [1, 32], strides = [1, 1]} : vector<2x32xf32> to vector<1x32xf32>
    %c1 = arith.constant 1 : index
    %c0_133 = arith.constant 0 : index
    %159 = vector.load %arg15[%c1, %c0_133] : memref<2x128xf32, #tpu.memory_space<vmem>>, vector<1x32xf32>
    tpu.vector_store %arg15[%c1, %c0_133], %158 {strides = array<i32>} : memref<2x128xf32, #tpu.memory_space<vmem>>, vector<1x32xf32>,
    %160 = vector.extract_strided_slice %148 {offsets = [1, 0], sizes = [1, 32], strides = [1, 1]} : vector<2x32xf32> to vector<1x32xf32>
    %c1_134 = arith.constant 1 : index
    %c32_135 = arith.constant 32 : index
    %161 = vector.load %arg15[%c1_134, %c32_135] : memref<2x128xf32, #tpu.memory_space<vmem>>, vector<1x32xf32>
    tpu.vector_store %arg15[%c1_134, %c32_135], %160 {strides = array<i32>} : memref<2x128xf32, #tpu.memory_space<vmem>>, vector<1x32xf32>,
    %162 = vector.extract_strided_slice %149 {offsets = [0, 0], sizes = [1, 32], strides = [1, 1]} : vector<2x32xf32> to vector<1x32xf32>
    %c1_136 = arith.constant 1 : index
    %c64_137 = arith.constant 64 : index
    %163 = vector.load %arg15[%c1_136, %c64_137] : memref<2x128xf32, #tpu.memory_space<vmem>>, vector<1x32xf32>
    tpu.vector_store %arg15[%c1_136, %c64_137], %162 {strides = array<i32>} : memref<2x128xf32, #tpu.memory_space<vmem>>, vector<1x32xf32>,
    %164 = vector.extract_strided_slice %149 {offsets = [1, 0], sizes = [1, 32], strides = [1, 1]} : vector<2x32xf32> to vector<1x32xf32>
    %c1_138 = arith.constant 1 : index
    %c96_139 = arith.constant 96 : index
    %165 = vector.load %arg15[%c1_138, %c96_139] : memref<2x128xf32, #tpu.memory_space<vmem>>, vector<1x32xf32>
    tpu.vector_store %arg15[%c1_138, %c96_139], %164 {strides = array<i32>} : memref<2x128xf32, #tpu.memory_space<vmem>>, vector<1x32xf32>,
    %c0_140 = arith.constant 0 : index
    %c0_141 = arith.constant 0 : index
    %166 = vector.load %arg15[%c0_140, %c0_141] : memref<2x128xf32, #tpu.memory_space<vmem>>, vector<2x128xf32>
    %c0_142 = arith.constant 0 : index
    %c0_143 = arith.constant 0 : index
    %167 = vector.load %arg8[%c0_142, %c0_143] : memref<128x32xf32, #tpu.memory_space<vmem>>, vector<128x32xf32>
    %cst_144 = arith.constant dense<0.000000e+00> : vector<2x32xf32>
    %168 = tpu.matmul %166, %167, %cst_144 {dimension_numbers = #tpu.dot_dimension_numbers<[1], [0], [0], [1], [0, 0, 1, 1], [], []>} : vector<2x128xf32>, vector<128x32xf32>, vector<2x32xf32> -> vector<2x32xf32>
    %c0_145 = arith.constant 0 : index
    %c0_146 = arith.constant 0 : index
    %169 = vector.load %arg9[%c0_145, %c0_146] : memref<1x32xf32, #tpu.memory_space<vmem>>, vector<1x32xf32>
    %170 = vector.broadcast %169 : vector<1x32xf32> to vector<2x32xf32>
    %171 = arith.addf %168, %170 : vector<2x32xf32>
    %172 = vector.extract_strided_slice %171 {offsets = [0, 0], sizes = [2, 16], strides = [1, 1]} : vector<2x32xf32> to vector<2x16xf32>
    %173 = vector.extract_strided_slice %171 {offsets = [0, 16], sizes = [2, 16], strides = [1, 1]} : vector<2x32xf32> to vector<2x16xf32>
    %cst_147 = arith.constant 5.000000e-01 : f32
    %174 = vector.broadcast %cst_147 : f32 to vector<2x16xf32>
    %175 = arith.mulf %174, %173 : vector<2x16xf32>
    %176 = math.exp %175 : vector<2x16xf32>
    %c0_148 = arith.constant 0 : index
    %c0_149 = arith.constant 0 : index
    %177 = vector.load %arg10[%c0_148, %c0_149] : memref<2x16xf32, #tpu.memory_space<vmem>>, vector<2x16xf32>
    %178 = arith.mulf %177, %176 : vector<2x16xf32>
    %179 = arith.addf %178, %172 : vector<2x16xf32>
    %180 = tpu.concatenate %179, %172, %173, %176 in 1 : vector<2x16xf32>, vector<2x16xf32>, vector<2x16xf32>, vector<2x16xf32> -> vector<2x64xf32>
    %c0_150 = arith.constant 0 : index
    %c0_151 = arith.constant 0 : index
    %181 = vector.load %arg11[%c0_150, %c0_151] : memref<2x64xf32, #tpu.memory_space<vmem>>, vector<2x64xf32>
    tpu.vector_store %arg11[%c0_150, %c0_151], %180 {strides = array<i32>} : memref<2x64xf32, #tpu.memory_space<vmem>>, vector<2x64xf32>,
    return
  }
  func.func @transform_0(%arg0: i32) -> (i32, i32) {
    %c0_i32 = arith.constant 0 : i32
    %c0_i32_0 = arith.constant 0 : i32
    %c0_i32_1 = arith.constant 0 : i32
    return %c0_i32, %c0_i32_0 : i32, i32
  }
  func.func @transform_1(%arg0: i32) -> (i32, i32) {
    %c0_i32 = arith.constant 0 : i32
    %c0_i32_0 = arith.constant 0 : i32
    %c0_i32_1 = arith.constant 0 : i32
    return %c0_i32, %c0_i32_0 : i32, i32
  }
  func.func @transform_2(%arg0: i32) -> (i32, i32) {
    %c0_i32 = arith.constant 0 : i32
    %c0_i32_0 = arith.constant 0 : i32
    %c0_i32_1 = arith.constant 0 : i32
    return %c0_i32, %c0_i32_0 : i32, i32
  }
  func.func @transform_3(%arg0: i32) -> (i32, i32) {
    %c0_i32 = arith.constant 0 : i32
    %c0_i32_0 = arith.constant 0 : i32
    %c0_i32_1 = arith.constant 0 : i32
    return %c0_i32, %c0_i32_0 : i32, i32
  }
  func.func @transform_4(%arg0: i32) -> (i32, i32) {
    %c0_i32 = arith.constant 0 : i32
    %c0_i32_0 = arith.constant 0 : i32
    %c0_i32_1 = arith.constant 0 : i32
    return %c0_i32, %c0_i32_0 : i32, i32
  }
  func.func @transform_5(%arg0: i32) -> (i32, i32) {
    %c0_i32 = arith.constant 0 : i32
    %c0_i32_0 = arith.constant 0 : i32
    %c0_i32_1 = arith.constant 0 : i32
    return %c0_i32, %c0_i32_0 : i32, i32
  }
  func.func @transform_6(%arg0: i32) -> (i32, i32) {
    %c0_i32 = arith.constant 0 : i32
    %c0_i32_0 = arith.constant 0 : i32
    %c0_i32_1 = arith.constant 0 : i32
    return %c0_i32, %c0_i32_0 : i32, i32
  }
  func.func @transform_7(%arg0: i32) -> (i32, i32) {
    %c0_i32 = arith.constant 0 : i32
    %c0_i32_0 = arith.constant 0 : i32
    %c0_i32_1 = arith.constant 0 : i32
    return %c0_i32, %c0_i32_0 : i32, i32
  }
  func.func @transform_8(%arg0: i32) -> (i32, i32) {
    %c0_i32 = arith.constant 0 : i32
    %c0_i32_0 = arith.constant 0 : i32
    %c0_i32_1 = arith.constant 0 : i32
    return %c0_i32, %c0_i32_0 : i32, i32
  }
  func.func @transform_9(%arg0: i32) -> (i32, i32) {
    %c0_i32 = arith.constant 0 : i32
    %c0_i32_0 = arith.constant 0 : i32
    %c0_i32_1 = arith.constant 0 : i32
    return %c0_i32, %c0_i32_0 : i32, i32
  }
  func.func @transform_10(%arg0: i32) -> (i32, i32) {
    %c0_i32 = arith.constant 0 : i32
    %c0_i32_0 = arith.constant 0 : i32
    %c0_i32_1 = arith.constant 0 : i32
    return %c0_i32, %c0_i32_0 : i32, i32
  }
}

</mosaic_0001>

<bundles_post_ra>
// kernel: tpu_custom_call.1
= control target key start
LH: loop header
LB: loop body
LE: loop exit
PB: predicated region body
PF: predicated region fallthrough
CT: control target
= control target key end

     0   :  { %vm53_vm0 = vcmask 130048   ;;  %v2685_v4 = vmov 0.0|0.0   ;;  %vm2686_vm1 = vmmov 0   ;;  %v2687_v7 = vmov 0.0   ;;  %s3235_s0 = inlined_call_operand.vmem [shape: f32[64,16], index: 0, kind: input, shape index: {}]   ;;  %s3236_s1 = inlined_call_operand.vmem [shape: f32[16,64], index: 1, kind: input, shape index: {}]   ;;  %s3237_s2 = inlined_call_operand.vmem [shape: f32[64,64], index: 2, kind: input, shape index: {}]   ;;  %s3238_s3 = inlined_call_operand.vmem [shape: f32[1,64], index: 3, kind: input, shape index: {}]   ;;  %s3239_s4 = inlined_call_operand.vmem [shape: f32[64,64], index: 4, kind: input, shape index: {}]   ;;  %s3240_s5 = inlined_call_operand.vmem [shape: f32[64,64], index: 5, kind: input, shape index: {}]   ;;  %s3241_s6 = inlined_call_operand.vmem [shape: f32[1,64], index: 6, kind: input, shape index: {}]   ;;  %s3242_s7 = inlined_call_operand.vmem [shape: f32[128,32], index: 7, kind: input, shape index: {}]   ;;  %s3243_s8 = inlined_call_operand.vmem [shape: f32[1,32], index: 8, kind: input, shape index: {}]   ;;  %s3244_s9 = inlined_call_operand.vmem [shape: f32[2,16], index: 9, kind: input, shape index: {}]   ;;  %s3245_s10 = inlined_call_operand.hbm [shape: f32[2,64], index: 10, kind: output, shape index: {}]  }
   0x1   :  { %v44_v0 = vld [vmem:[%s3236_s1] sm:$0xff]  ;;  %v45_v1 = vld [vmem:[%s3236_s1 + $0x8] sm:$0xff]  ;;  %2399 = vmatprep.subr.bf16.mxu0 %v2685_v4  ;;  %2051 = vmatprep.mubr.msk.f32.mxu0 %vm2686_vm1, %v2687_v7  ;;  %v194_v10 = vld [vmem:[%s3237_s2 + $0x10] sm:$0xff] }
   0x2   :  { %v36_v2 = vld [vmem:[%s3235_s0] sm:$0xff]  ;;  %v2383_v3 = vpack.c.bf16 %v45_v1, %v44_v0  ;;  %v193_v6 = vld [vmem:[%s3237_s2 + $0x8] sm:$0xff]  ;;  %v195_v11 = vld [vmem:[%s3237_s2 + $0x18] sm:$0xff] }
   0x3   :  { %2004 = vmatprep.mubr.msk.f32.mxu1 %vm53_vm0, %v36_v2  ;;  %v192_v5 = vld [vmem:[%s3237_s2] sm:$0xff]  ;;  %v37_v9 = vld [vmem:[%s3235_s0 + $0x8] sm:$0xff]  ;;  %v38_v12 = vld [vmem:[%s3235_s0 + $0x10] sm:$0xff] }
   0x4   :  { %2384 = vmatprep.subr.bf16.mxu1 %v2383_v3  ;;  %v2767_v8 = vpack.c.bf16 %v193_v6, %v192_v5 }
   0x5   :  { %2386 = vmatpush3.bf16.msra.mxu1 %v2383_v3 }
   0x6   :  { %2387 = vmatprep.subr.bf16.mxu1 %v2685_v4  ;;  %2401 = vmatpush3.bf16.msra.mxu0 %v2767_v8 }
   0x7   :  { %2402 = vmatprep.subr.bf16.mxu0 %v2685_v4 }
   0x8   :  { %15 = vsyncpa [#allocation7], 0  ;;  %2005 = vmatmul.mubr.msk.f32.vlgmr.msra.gmra.mrb[0].mxu1 %vm53_vm0, %v37_v9  ;;  %v2785_v13 = vpack.c.bf16 %v195_v11, %v194_v10  ;;  %v39_v14 = vld [vmem:[%s3235_s0 + $0x18] sm:$0xff]  ;;  %v196_v15 = vld [vmem:[%s3237_s2 + $0x20] sm:$0xff]  ;;  %vm183_vm2 = vcmask 523264   ;;  %vm202_vm3 = vcmask 261120  }
   0x9   :  { %2007 = vmatprep.mubr.msk.f32.mxu1 %vm53_vm0, %v38_v12  ;;  %2389 = vmatpush3.bf16.msra.mxu1 %v2767_v8  ;;  %v197_v16 = vld [vmem:[%s3237_s2 + $0x28] sm:$0xff]  ;;  %v40_v17 = vld [vmem:[%s3235_s0 + $0x20] sm:$0xff]  ;;  %v198_v20 = vld [vmem:[%s3237_s2 + $0x30] sm:$0xff]  ;;  %vm280_vm4 = vcmask 523520   ;;  %vm1623_vm5 = vcmask 253952   ;;  %s2689_s13 = smov 32  }
   0xa   :  { %2390 = vmatprep.subr.bf16.mxu1 %v2685_v4  ;;  %2404 = vmatpush3.bf16.msra.mxu0 %v2785_v13  ;;  %v2805_v18 = vpack.c.bf16 %v197_v16, %v196_v15  ;;  %v41_v19 = vld [vmem:[%s3235_s0 + $0x28] sm:$0xff]  ;;  %v199_v21 = vld [vmem:[%s3237_s2 + $0x38] sm:$0xff]  ;;  %v42_v22 = vld [vmem:[%s3235_s0 + $0x30] sm:$0xff]  ;;  %vm1629_vm6 = vcmask 517377   ;;  %vm1631_vm7 = vcmask 778752   ;;  %vm1636_vm8 = vcmask 1042177  }
   0xb   :  { %2405 = vmatprep.subr.bf16.mxu0 %v2685_v4  ;;  %v2825_v23 = vpack.c.bf16 %v199_v21, %v198_v20  ;;  %v43_v24 = vld [vmem:[%s3235_s0 + $0x38] sm:$0xff]  ;;  %v1780_v25 = vld [vmem:[%s3238_s3] ss:$0 sm:$0xff]  ;;  %s2691_s1 = smov 112   ;;  %vm1762_vm9 = vcmask 392192   ;;  %vm1764_vm10 = vcmask 517120  }
   0xc   :  { %2008 = vmatmul.mubr.msk.f32.gmra.mrb[2].mxu1 %vm53_vm0, %v39_v14 }
   0xd   :  { %2010 = vmatprep.mubr.msk.f32.mxu1 %vm53_vm0, %v40_v17  ;;  %2392 = vmatpush3.bf16.msra.mxu1 %v2785_v13 }
   0xe   :  { %2393 = vmatprep.subr.bf16.mxu1 %v2685_v4  ;;  %2407 = vmatpush3.bf16.msra.mxu0 %v2805_v18 }
   0xf   :  { %2408 = vmatprep.subr.bf16.mxu0 %v2685_v4 }
  0x10   :  { %2011 = vmatmul.mubr.msk.f32.gmra.mrb[4].mxu1 %vm53_vm0, %v41_v19 }
  0x11   :  { %2013 = vmatprep.mubr.msk.f32.mxu1 %vm53_vm0, %v42_v22  ;;  %2395 = vmatpush3.bf16.msra.mxu1 %v2805_v18 }
  0x12   :  { %2396 = vmatprep.subr.bf16.mxu1 %v2685_v4  ;;  %2410 = vmatpush3.bf16.msra.mxu0 %v2825_v23 }
  0x13   :  { %2423 = vmatprep.subr.bf16.mxu0 %v2685_v4 }
  0x14   :  { %2014 = vmatmul.mubr.msk.f32.gmra.mrb[6].mxu1 %vm53_vm0, %v43_v24  ;;  %v850_v24 = vld [vmem:[%s3239_s4] sm:$0xff] }
  0x15   :  { %2398 = vmatpush3.bf16.msra.mxu1 %v2825_v23  ;;  %2032 = vmatprep.mubr.msk.f32.mxu1 %vm2686_vm1, %v2687_v7 }
  0x16   :  { %2411 = vmatprep.subr.bf16.mxu1 %v2685_v4 }
  0x18   :  { %2033 = vmatmul.mubr.f32.vlgmr.msra.gmra.mrb[8].mxu1 %v2687_v7 }
  0x19   :  { %2413 = vmatpush3.bf16.msra.mxu1 %v2767_v8  ;;  %2070 = vmatprep.mubr.msk.f32.mxu1 %vm2686_vm1, %v2687_v7 }
  0x1a   :  { %2414 = vmatprep.subr.bf16.mxu1 %v2685_v4 }
  0x1d   :  { %2416 = vmatpush3.bf16.msra.mxu1 %v2785_v13 }
  0x1e   :  { %2417 = vmatprep.subr.bf16.mxu1 %v2685_v4 }
  0x21   :  { %2419 = vmatpush3.bf16.msra.mxu1 %v2805_v18 }
  0x22   :  { %2420 = vmatprep.subr.bf16.mxu1 %v2685_v4 }
  0x25   :  { %2422 = vmatpush3.bf16.msra.mxu1 %v2825_v23 }
  0x26   :  { %2435 = vmatprep.subr.bf16.mxu1 %v2685_v4 }
  0xdb   :  { %v2006_v26 = vpop.f32.mrb[0].mxu1 }
  0xdc   :  { %v150_v27 = vadd.f32 %v2006_v26, %v1780_v25  ;;  %v144_v28 = vpop.f32.mrb[1].mxu1 }
  0xdd   :  { %v145_v29 = vadd.f32 %v1780_v25, %v144_v28  ;;  %v853_v28 = vld [vmem:[%s3239_s4 + $0x18] sm:$0xff] }
  0xde   :  { %185 = vst.msk [vmem:[#allocation2 + $0x8] sm:$0xff] %vm183_vm2, %v150_v27  ;;  %v852_v27 = vld [vmem:[%s3239_s4 + $0x10] sm:$0xff] }
  0xdf   :  { %184 = vst.msk [vmem:[#allocation2] sm:$0xff] %vm183_vm2, %v145_v29  ;;  %v2009_v30 = vpop.f32.mrb[2].mxu1  ;;  %v2487_v29 = vpack.c.bf16 %v853_v28, %v852_v27 }
  0xe0   :  { %v160_v31 = vadd.f32 %v2009_v30, %v1780_v25  ;;  %v154_v32 = vpop.f32.mrb[3].mxu1  ;;  %v854_v30 = vld [vmem:[%s3239_s4 + $0x20] sm:$0xff] }
  0xe1   :  { %v155_v33 = vadd.f32 %v1780_v25, %v154_v32 }
  0xe2   :  { %187 = vst.msk [vmem:[#allocation2 + $0x18] sm:$0xff] %vm183_vm2, %v160_v31  ;;  %v855_v31 = vld [vmem:[%s3239_s4 + $0x28] sm:$0xff] }
  0xe3   :  { %186 = vst.msk [vmem:[#allocation2 + $0x10] sm:$0xff] %vm183_vm2, %v155_v33  ;;  %v2012_v34 = vpop.f32.mrb[4].mxu1  ;;  %v2491_v32 = vpack.c.bf16 %v855_v31, %v854_v30  ;;  %v856_v33 = vld [vmem:[%s3239_s4 + $0x30] sm:$0xff] }
  0xe4   :  { %v170_v35 = vadd.f32 %v2012_v34, %v1780_v25  ;;  %v164_v36 = vpop.f32.mrb[5].mxu1  ;;  %v857_v34 = vld [vmem:[%s3239_s4 + $0x38] sm:$0xff] }
  0xe5   :  { %v165_v37 = vadd.f32 %v1780_v25, %v164_v36  ;;  %v282_v53 = vld [vmem:[#allocation2 + $0x8] sm:$0xff]  ;;  %v1002_v36 = vld [vmem:[%s3240_s5] sm:$0xff] }
  0xe6   :  { %189 = vst.msk [vmem:[#allocation2 + $0x28] sm:$0xff] %vm183_vm2, %v170_v35  ;;  %v200_v50 = vld [vmem:[#allocation2] sm:$0xff]  ;;  %v2495_v35 = vpack.c.bf16 %v857_v34, %v856_v33 }
  0xe7   :  { %188 = vst.msk [vmem:[#allocation2 + $0x20] sm:$0xff] %vm183_vm2, %v165_v37  ;;  %v2015_v38 = vpop.f32.mrb[6].mxu1  ;;  %v1003_v37 = vld [vmem:[%s3240_s5 + $0x8] sm:$0xff] }
  0xe8   :  { %v180_v39 = vadd.f32 %v2015_v38, %v1780_v25  ;;  %v174_v40 = vpop.f32.mrb[7].mxu1  ;;  %v2992_v38 = vpack.c.bf16 %v1003_v37, %v1002_v36 }
  0xe9   :  { %v175_v41 = vadd.f32 %v1780_v25, %v174_v40  ;;  %v2862_v46 = vld [vmem:[#allocation2 + $0x18] sm:$0xff]  ;;  %v851_v25 = vld [vmem:[%s3239_s4 + $0x8] sm:$0xff] }
  0xea   :  { %191 = vst.msk [vmem:[#allocation2 + $0x38] sm:$0xff] %vm183_vm2, %v180_v39  ;;  %v362_v44 = vld [vmem:[#allocation2 + $0x10] sm:$0xff]  ;;  %v2483_v26 = vpack.c.bf16 %v851_v25, %v850_v24  ;;  %v1005_v40 = vld [vmem:[%s3240_s5 + $0x18] sm:$0xff] }
  0xeb   :  { %190 = vst.msk [vmem:[#allocation2 + $0x30] sm:$0xff] %vm183_vm2, %v175_v41  ;;  %v273_v42 = vpop.f32.mrb[8].mxu1  ;;  %v1004_v39 = vld [vmem:[%s3240_s5 + $0x10] sm:$0xff] }
  0xec   :  { %v2034_v43 = vpop.f32.mrb[9].mxu1  ;;  %v3002_v41 = vpack.c.bf16 %v1005_v40, %v1004_v39 }
  0xed   :  { %v363_v45 = vld [vmem:[#allocation2 + $0x28] sm:$0xff] }
  0xee   :  { %v2864_v47 = vld [vmem:[#allocation2 + $0x20] sm:$0xff]  ;;  %v2867_v48 = vsel %vm202_vm3, %v363_v45, %v362_v44  ;;  %v364_v0 = vsel %vm202_vm3, %v362_v44, %v363_v45  ;;  %v1007_v43 = vld [vmem:[%s3240_s5 + $0x28] sm:$0xff]  ;;  %v1008_v44 = vld [vmem:[%s3240_s5 + $0x30] sm:$0xff] }
  0xef   :  { %v2872_v49 = vsel %vm202_vm3, %v2864_v47, %v2862_v46  ;;  %v444_v6 = vsel %vm202_vm3, %v2862_v46, %v2864_v47  ;;  %v1009_v46 = vld [vmem:[%s3240_s5 + $0x38] sm:$0xff] }
  0xf0   :  { %v3021_v47 = vpack.c.bf16 %v1009_v46, %v1008_v44 }
  0xf1   :  { %v201_v51 = vld [vmem:[#allocation2 + $0x38] sm:$0xff] }
  0xf2   :  { %v203_v52 = vsel %vm202_vm3, %v200_v50, %v201_v51  ;;  %v283_v54 = vld [vmem:[#allocation2 + $0x30] sm:$0xff]  ;;  %v2876_v55 = vsel %vm202_vm3, %v201_v51, %v200_v50 }
  0xf3   :  { %v277_v56 = vadd.f32 %v273_v42, %v203_v52  ;;  %v2879_v57 = vsel %vm202_vm3, %v283_v54, %v282_v53  ;;  %v284_v59 = vsel %vm202_vm3, %v282_v53, %v283_v54  ;;  %v1006_v42 = vld [vmem:[%s3240_s5 + $0x20] sm:$0xff]  ;;  %s2688_s5 = smov 64  }
  0xf4   :  { %v3015_v45 = vpack.c.bf16 %v1007_v43, %v1006_v42 }
  0xf5   :  { %2627 = vtanh.f32 %v277_v56 }
  0xff   :  { %v2628_v58 = vpop.eup %2627 }
 0x100   :  { %279 = vst.msk [vmem:[#allocation3] sm:$0xff] %vm202_vm3, %v2628_v58  ;;  %2052 = vmatmul.mubr.msk.f32.vlgmr.msra.gmra.mrb[0].mxu0 %vm183_vm2, %v2628_v58 }
 0x101   :  { %281 = vst.msk [vmem:[#allocation3 + $0x38] sm:$0xff] %vm280_vm4, %v2628_v58  ;;  %2425 = vmatpush3.bf16.msra.mxu0 %v2767_v8  ;;  %2089 = vmatprep.mubr.msk.f32.mxu0 %vm2686_vm1, %v2687_v7 }
 0x102   :  { %2426 = vmatprep.subr.bf16.mxu0 %v2685_v4 }
 0x105   :  { %2428 = vmatpush3.bf16.msra.mxu0 %v2785_v13 }
 0x106   :  { %2429 = vmatprep.subr.bf16.mxu0 %v2685_v4 }
 0x109   :  { %2431 = vmatpush3.bf16.msra.mxu0 %v2805_v18 }
 0x10a   :  { %2432 = vmatprep.subr.bf16.mxu0 %v2685_v4 }
 0x10d   :  { %2434 = vmatpush3.bf16.msra.mxu0 %v2825_v23 }
 0x10e   :  { %2447 = vmatprep.subr.bf16.mxu0 %v2685_v4 }
 0x1d3   :  { %v354_v60 = vpop.f32.mrb[0].mxu0 }
 0x1d4   :  { %v358_v61 = vadd.f32 %v354_v60, %v284_v59  ;;  %v2053_v62 = vpop.f32.mrb[1].mxu0 }
 0x1d6   :  { %2629 = vtanh.f32 %v358_v61 }
 0x1e0   :  { %v2630_v63 = vpop.eup %2629 }
 0x1e1   :  { %360 = vst.msk [vmem:[#allocation3 + $0x8] sm:$0xff] %vm202_vm3, %v2630_v63  ;;  %2071 = vmatmul.mubr.msk.f32.vlgmr.msra.gmra.mrb[10].mxu1 %vm183_vm2, %v2630_v63 }
 0x1e2   :  { %361 = vst.msk [vmem:[#allocation3 + $0x30] sm:$0xff] %vm280_vm4, %v2630_v63  ;;  %2437 = vmatpush3.bf16.msra.mxu1 %v2767_v8  ;;  %2108 = vmatprep.mubr.msk.f32.mxu1 %vm2686_vm1, %v2687_v7 }
 0x1e3   :  { %2438 = vmatprep.subr.bf16.mxu1 %v2685_v4 }
 0x1e6   :  { %2440 = vmatpush3.bf16.msra.mxu1 %v2785_v13 }
 0x1e7   :  { %2441 = vmatprep.subr.bf16.mxu1 %v2685_v4 }
 0x1ea   :  { %2443 = vmatpush3.bf16.msra.mxu1 %v2805_v18 }
 0x1eb   :  { %2444 = vmatprep.subr.bf16.mxu1 %v2685_v4 }
 0x1ee   :  { %2446 = vmatpush3.bf16.msra.mxu1 %v2825_v23 }
 0x1ef   :  { %2459 = vmatprep.subr.bf16.mxu1 %v2685_v4 }
 0x2b4   :  { %v434_v1 = vpop.f32.mrb[10].mxu1 }
 0x2b5   :  { %v438_v2 = vadd.f32 %v434_v1, %v364_v0  ;;  %v2072_v3 = vpop.f32.mrb[11].mxu1  ;;  %v1796_v0 = vld [vmem:[%s3241_s6] ss:$0 sm:$0xff] }
 0x2b7   :  { %2631 = vtanh.f32 %v438_v2 }
 0x2c1   :  { %v2632_v5 = vpop.eup %2631 }
 0x2c2   :  { %440 = vst.msk [vmem:[#allocation3 + $0x10] sm:$0xff] %vm202_vm3, %v2632_v5  ;;  %2090 = vmatmul.mubr.msk.f32.vlgmr.msra.gmra.mrb[2].mxu0 %vm183_vm2, %v2632_v5 }
 0x2c3   :  { %441 = vst.msk [vmem:[#allocation3 + $0x28] sm:$0xff] %vm280_vm4, %v2632_v5  ;;  %2449 = vmatpush3.bf16.msra.mxu0 %v2767_v8  ;;  %2127 = vmatprep.mubr.msk.f32.mxu0 %vm2686_vm1, %v2687_v7 }
 0x2c4   :  { %2450 = vmatprep.subr.bf16.mxu0 %v2685_v4 }
 0x2c7   :  { %2452 = vmatpush3.bf16.msra.mxu0 %v2785_v13 }
 0x2c8   :  { %2453 = vmatprep.subr.bf16.mxu0 %v2685_v4 }
 0x2cb   :  { %2455 = vmatpush3.bf16.msra.mxu0 %v2805_v18 }
 0x2cc   :  { %2456 = vmatprep.subr.bf16.mxu0 %v2685_v4 }
 0x2cf   :  { %2458 = vmatpush3.bf16.msra.mxu0 %v2825_v23 }
 0x2d0   :  { %2471 = vmatprep.subr.bf16.mxu0 %v2685_v4 }
 0x395   :  { %v514_v9 = vpop.f32.mrb[2].mxu0 }
 0x396   :  { %v518_v10 = vadd.f32 %v514_v9, %v444_v6  ;;  %v2091_v11 = vpop.f32.mrb[3].mxu0 }
 0x398   :  { %2633 = vtanh.f32 %v518_v10 }
 0x3a2   :  { %v2634_v12 = vpop.eup %2633 }
 0x3a3   :  { %520 = vst.msk [vmem:[#allocation3 + $0x18] sm:$0xff] %vm202_vm3, %v2634_v12  ;;  %2109 = vmatmul.mubr.msk.f32.vlgmr.msra.gmra.mrb[12].mxu1 %vm183_vm2, %v2634_v12 }
 0x3a4   :  { %521 = vst.msk [vmem:[#allocation3 + $0x20] sm:$0xff] %vm280_vm4, %v2634_v12  ;;  %2461 = vmatpush3.bf16.msra.mxu1 %v2767_v8  ;;  %2146 = vmatprep.mubr.msk.f32.mxu1 %vm2686_vm1, %v2687_v7 }
 0x3a5   :  { %2462 = vmatprep.subr.bf16.mxu1 %v2685_v4 }
 0x3a8   :  { %2464 = vmatpush3.bf16.msra.mxu1 %v2785_v13 }
 0x3a9   :  { %2465 = vmatprep.subr.bf16.mxu1 %v2685_v4 }
 0x3ac   :  { %2467 = vmatpush3.bf16.msra.mxu1 %v2805_v18 }
 0x3ad   :  { %2468 = vmatprep.subr.bf16.mxu1 %v2685_v4 }
 0x3b0   :  { %2470 = vmatpush3.bf16.msra.mxu1 %v2825_v23 }
 0x3b1   :  { %2484 = vmatprep.subr.bf16.mxu1 %v2483_v26 }
 0x476   :  { %v594_v14 = vpop.f32.mrb[12].mxu1 }
 0x477   :  { %v598_v15 = vadd.f32 %v594_v14, %v2872_v49  ;;  %v2110_v16 = vpop.f32.mrb[13].mxu1 }
 0x479   :  { %2635 = vtanh.f32 %v598_v15 }
 0x483   :  { %v2636_v17 = vpop.eup %2635 }
 0x484   :  { %600 = vst.msk [vmem:[#allocation3 + $0x20] sm:$0xff] %vm202_vm3, %v2636_v17  ;;  %2128 = vmatmul.mubr.msk.f32.vlgmr.msra.gmra.mrb[4].mxu0 %vm183_vm2, %v2636_v17 }
 0x485   :  { %601 = vst.msk [vmem:[#allocation3 + $0x18] sm:$0xff] %vm280_vm4, %v2636_v17  ;;  %2473 = vmatpush3.bf16.msra.mxu0 %v2767_v8  ;;  %2165 = vmatprep.mubr.msk.f32.mxu0 %vm2686_vm1, %v2687_v7 }
 0x486   :  { %2474 = vmatprep.subr.bf16.mxu0 %v2685_v4 }
 0x489   :  { %2476 = vmatpush3.bf16.msra.mxu0 %v2785_v13 }
 0x48a   :  { %2477 = vmatprep.subr.bf16.mxu0 %v2685_v4 }
 0x48b   :  { %v846_v56 = vld [vmem:[#allocation3 + $0x20] sm:$0xff] }
 0x48d   :  { %2479 = vmatpush3.bf16.msra.mxu0 %v2805_v18 }
 0x48e   :  { %2480 = vmatprep.subr.bf16.mxu0 %v2685_v4 }
 0x491   :  { %2482 = vmatpush3.bf16.msra.mxu0 %v2825_v23 }
 0x492   :  { %2499 = vmatprep.subr.bf16.mxu0 %v2685_v4 }
 0x557   :  { %v674_v19 = vpop.f32.mrb[4].mxu0 }
 0x558   :  { %v678_v8 = vadd.f32 %v674_v19, %v2867_v48  ;;  %v2129_v20 = vpop.f32.mrb[5].mxu0 }
 0x55a   :  { %2637 = vtanh.f32 %v678_v8 }
 0x564   :  { %v2638_v21 = vpop.eup %2637 }
 0x565   :  { %680 = vst.msk [vmem:[#allocation3 + $0x28] sm:$0xff] %vm202_vm3, %v2638_v21  ;;  %2147 = vmatmul.mubr.msk.f32.vlgmr.msra.gmra.mrb[14].mxu1 %vm183_vm2, %v2638_v21 }
 0x566   :  { %681 = vst.msk [vmem:[#allocation3 + $0x10] sm:$0xff] %vm280_vm4, %v2638_v21  ;;  %2486 = vmatpush3.bf16.msra.mxu1 %v2483_v26 }
 0x567   :  { %2488 = vmatprep.subr.bf16.mxu1 %v2487_v29 }
 0x56a   :  { %2490 = vmatpush3.bf16.msra.mxu1 %v2487_v29 }
 0x56b   :  { %2492 = vmatprep.subr.bf16.mxu1 %v2491_v32 }
 0x56d   :  { %v844_v54 = vld [vmem:[#allocation3 + $0x10] sm:$0xff] }
 0x56e   :  { %2494 = vmatpush3.bf16.msra.mxu1 %v2491_v32 }
 0x56f   :  { %2496 = vmatprep.subr.bf16.mxu1 %v2495_v35 }
 0x572   :  { %2498 = vmatpush3.bf16.msra.mxu1 %v2495_v35 }
 0x573   :  { %2511 = vmatprep.subr.bf16.mxu1 %v2685_v4 }
 0x638   :  { %v754_v13 = vpop.f32.mrb[14].mxu1 }
 0x639   :  { %v758_v18 = vadd.f32 %v754_v13, %v2879_v57  ;;  %v2148_v22 = vpop.f32.mrb[15].mxu1  ;;  %v847_v57 = vld [vmem:[#allocation3 + $0x28] sm:$0xff] }
 0x63b   :  { %2639 = vtanh.f32 %v758_v18 }
 0x645   :  { %v2640_v23 = vpop.eup %2639 }
 0x646   :  { %760 = vst.msk [vmem:[#allocation3 + $0x30] sm:$0xff] %vm202_vm3, %v2640_v23  ;;  %2166 = vmatmul.mubr.msk.f32.vlgmr.msra.gmra.mrb[6].mxu0 %vm183_vm2, %v2640_v23 }
 0x647   :  { %761 = vst.msk [vmem:[#allocation3 + $0x8] sm:$0xff] %vm280_vm4, %v2640_v23  ;;  %2212 = vmatprep.mubr.msk.f32.mxu0 %vm2686_vm1, %v2687_v7  ;;  %2501 = vmatpush3.bf16.msra.mxu0 %v2992_v38 }
 0x648   :  { %2502 = vmatprep.subr.bf16.mxu0 %v2685_v4 }
 0x64b   :  { %2504 = vmatpush3.bf16.msra.mxu0 %v3002_v41 }
 0x64c   :  { %2505 = vmatprep.subr.bf16.mxu0 %v2685_v4 }
 0x64d   :  { %v848_v58 = vld [vmem:[#allocation3 + $0x30] sm:$0xff] }
 0x64e   :  { %v843_v53 = vld [vmem:[#allocation3 + $0x8] sm:$0xff] }
 0x64f   :  { %2507 = vmatpush3.bf16.msra.mxu0 %v3015_v45 }
 0x650   :  { %2508 = vmatprep.subr.bf16.mxu0 %v2685_v4 }
 0x653   :  { %2510 = vmatpush3.bf16.msra.mxu0 %v3021_v47 }
 0x654   :  { %2523 = vmatprep.subr.bf16.mxu0 %v2685_v4 }
 0x656   :  { %2213 = vmatmul.mubr.f32.vlgmr.msra.gmra.mrb[8].mxu0 %v2687_v7 }
 0x657   :  { %2525 = vmatpush3.bf16.msra.mxu0 %v2992_v38  ;;  %2250 = vmatprep.mubr.msk.f32.mxu0 %vm2686_vm1, %v2687_v7 }
 0x658   :  { %2526 = vmatprep.subr.bf16.mxu0 %v2685_v4 }
 0x65b   :  { %2528 = vmatpush3.bf16.msra.mxu0 %v3002_v41 }
 0x65c   :  { %2529 = vmatprep.subr.bf16.mxu0 %v2685_v4 }
 0x65f   :  { %2531 = vmatpush3.bf16.msra.mxu0 %v3015_v45 }
 0x660   :  { %2532 = vmatprep.subr.bf16.mxu0 %v2685_v4 }
 0x663   :  { %2534 = vmatpush3.bf16.msra.mxu0 %v3021_v47 }
 0x664   :  { %2547 = vmatprep.subr.bf16.mxu0 %v2685_v4 }
 0x719   :  { %v834_v48 = vpop.f32.mrb[6].mxu0 }
 0x71a   :  { %v838_v49 = vadd.f32 %v834_v48, %v2876_v55  ;;  %v2167_v50 = vpop.f32.mrb[7].mxu0  ;;  %v845_v55 = vld [vmem:[#allocation3 + $0x18] sm:$0xff] }
 0x71c   :  { %2641 = vtanh.f32 %v838_v49 }
 0x726   :  { %v2642_v51 = vpop.eup %2641 }
 0x727   :  { %840 = vst.msk [vmem:[#allocation3 + $0x38] sm:$0xff] %vm202_vm3, %v2642_v51  ;;  %1633 = vrot.lane.b32.xlu1 %v2642_v51, %s2688_s5  ;;  %1626 = vrot.lane.b32.xlu0 %v2642_v51, %s2689_s13 }
 0x728   :  { %841 = vst.msk [vmem:[#allocation3] sm:$0xff] %vm280_vm4, %v2642_v51 }
 0x729   :  { %1624 = vst.msk [vmem:[#allocation5] sm:$0x1] %vm1623_vm5, %v2642_v51  ;;  %v1079_v61 = vpop.f32.mrb[8].mxu0 }
 0x72a   :  { %v2214_v63 = vpop.f32.mrb[9].mxu0 }
 0x72e   :  { %v849_v59 = vld [vmem:[#allocation3 + $0x38] sm:$0xff] }
 0x72f   :  { %v842_v52 = vld [vmem:[#allocation3] sm:$0xff] }
 0x730   :  { %2184 = vmatprep.mubr.msk.f32.mxu1 %vm183_vm2, %v842_v52 }
 0x731   :  { %2185 = vmatmul.mubr.msk.f32.vlgmr.msra.gmra.mrb[16].mxu1 %vm183_vm2, %v843_v53 }
 0x732   :  { %2187 = vmatprep.mubr.msk.f32.mxu1 %vm183_vm2, %v844_v54  ;;  %2513 = vmatpush3.bf16.msra.mxu1 %v2992_v38 }
 0x733   :  { %2514 = vmatprep.subr.bf16.mxu1 %v2685_v4 }
 0x735   :  { %2188 = vmatmul.mubr.msk.f32.gmra.mrb[18].mxu1 %vm183_vm2, %v845_v55 }
 0x736   :  { %2190 = vmatprep.mubr.msk.f32.mxu1 %vm183_vm2, %v846_v56  ;;  %2516 = vmatpush3.bf16.msra.mxu1 %v3002_v41 }
 0x737   :  { %2517 = vmatprep.subr.bf16.mxu1 %v2685_v4 }
 0x739   :  { %2191 = vmatmul.mubr.msk.f32.gmra.mrb[20].mxu1 %vm183_vm2, %v847_v57 }
 0x73a   :  { %2193 = vmatprep.mubr.msk.f32.mxu1 %vm183_vm2, %v848_v58  ;;  %2519 = vmatpush3.bf16.msra.mxu1 %v3015_v45 }
 0x73b   :  { %2520 = vmatprep.subr.bf16.mxu1 %v2685_v4 }
 0x73d   :  { %2194 = vmatmul.mubr.msk.f32.gmra.mrb[22].mxu1 %vm183_vm2, %v849_v59 }
 0x73e   :  { %2522 = vmatpush3.bf16.msra.mxu1 %v3021_v47  ;;  %2231 = vmatprep.mubr.msk.f32.mxu1 %vm2686_vm1, %v2687_v7 }
 0x73f   :  { %2535 = vmatprep.subr.bf16.mxu1 %v2685_v4 }
 0x799   :  { %v1627_v60 = vpop.permute.xlu0 %1626  ;;  %v1634_v62 = vpop.permute.xlu1 %1633 }
 0x79a   :  { %1630 = vst.msk [vmem:[#allocation5 - $0x1] sm:$0x2] %vm1629_vm6, %v1627_v60 }
 0x79b   :  { %1632 = vst.msk [vmem:[#allocation5] sm:$0x1] %vm1631_vm7, %v1627_v60 }
 0x79c   :  { %1637 = vst.msk [vmem:[#allocation5 - $0x1] sm:$0x2] %vm1636_vm8, %v1634_v62  ;;  %v1651_v62 = vld [vmem:[%s3242_s7 + $0x8] sm:$0xff] }
 0x804   :  { %v2186_v1 = vpop.f32.mrb[16].mxu1 }
 0x805   :  { %v961_v2 = vadd.f32 %v2186_v1, %v1796_v0  ;;  %v955_v3 = vpop.f32.mrb[17].mxu1 }
 0x806   :  { %v956_v5 = vadd.f32 %v1796_v0, %v955_v3  ;;  %v1655_v3 = vld [vmem:[%s3242_s7 + $0x28] sm:$0xff] }
 0x807   :  { %995 = vst.msk [vmem:[#allocation4 + $0x8] sm:$0xff] %vm183_vm2, %v961_v2  ;;  %v1654_v2 = vld [vmem:[%s3242_s7 + $0x20] sm:$0xff] }
 0x808   :  { %994 = vst.msk [vmem:[#allocation4] sm:$0xff] %vm183_vm2, %v956_v5  ;;  %v2189_v6 = vpop.f32.mrb[18].mxu1  ;;  %v2602_v5 = vpack.c.bf16 %v1655_v3, %v1654_v2 }
 0x809   :  { %v971_v9 = vadd.f32 %v2189_v6, %v1796_v0  ;;  %v965_v10 = vpop.f32.mrb[19].mxu1  ;;  %v1656_v6 = vld [vmem:[%s3242_s7 + $0x30] sm:$0xff] }
 0x80a   :  { %v966_v11 = vadd.f32 %v1796_v0, %v965_v10 }
 0x80b   :  { %997 = vst.msk [vmem:[#allocation4 + $0x18] sm:$0xff] %vm183_vm2, %v971_v9  ;;  %v1657_v9 = vld [vmem:[%s3242_s7 + $0x38] sm:$0xff] }
 0x80c   :  { %996 = vst.msk [vmem:[#allocation4 + $0x10] sm:$0xff] %vm183_vm2, %v966_v11  ;;  %v2192_v12 = vpop.f32.mrb[20].mxu1  ;;  %v2605_v10 = vpack.c.bf16 %v1657_v9, %v1656_v6  ;;  %v1658_v11 = vld [vmem:[%s3242_s7 + $0x40] sm:$0xff] }
 0x80d   :  { %v981_v14 = vadd.f32 %v2192_v12, %v1796_v0  ;;  %v975_v15 = vpop.f32.mrb[21].mxu1  ;;  %v1659_v12 = vld [vmem:[%s3242_s7 + $0x48] sm:$0xff] }
 0x80e   :  { %v976_v16 = vadd.f32 %v1796_v0, %v975_v15  ;;  %v1085_v28 = vld [vmem:[#allocation4 + $0x8] sm:$0xff]  ;;  %v1660_v15 = vld [vmem:[%s3242_s7 + $0x50] sm:$0xff] }
 0x80f   :  { %999 = vst.msk [vmem:[#allocation4 + $0x28] sm:$0xff] %vm183_vm2, %v981_v14  ;;  %v1010_v25 = vld [vmem:[#allocation4] sm:$0xff]  ;;  %v2608_v14 = vpack.c.bf16 %v1659_v12, %v1658_v11 }
 0x810   :  { %998 = vst.msk [vmem:[#allocation4 + $0x20] sm:$0xff] %vm183_vm2, %v976_v16  ;;  %v2195_v17 = vpop.f32.mrb[22].mxu1  ;;  %v1661_v16 = vld [vmem:[%s3242_s7 + $0x58] sm:$0xff] }
 0x811   :  { %v991_v19 = vadd.f32 %v2195_v17, %v1796_v0  ;;  %v985_v8 = vpop.f32.mrb[23].mxu1  ;;  %v2611_v17 = vpack.c.bf16 %v1661_v16, %v1660_v15 }
 0x812   :  { %v986_v20 = vadd.f32 %v1796_v0, %v985_v8  ;;  %v1241_v18 = vld [vmem:[#allocation4 + $0x18] sm:$0xff] }
 0x813   :  { %1001 = vst.msk [vmem:[#allocation4 + $0x38] sm:$0xff] %vm183_vm2, %v991_v19  ;;  %v1163_v21 = vld [vmem:[#allocation4 + $0x10] sm:$0xff]  ;;  %v1653_v0 = vld [vmem:[%s3242_s7 + $0x18] sm:$0xff] }
 0x814   :  { %1000 = vst.msk [vmem:[#allocation4 + $0x30] sm:$0xff] %vm183_vm2, %v986_v20 }
 0x816   :  { %v1164_v13 = vld [vmem:[#allocation4 + $0x28] sm:$0xff] }
 0x817   :  { %v1242_v22 = vld [vmem:[#allocation4 + $0x20] sm:$0xff]  ;;  %v3076_v23 = vsel %vm202_vm3, %v1164_v13, %v1163_v21  ;;  %v1165_v40 = vsel %vm202_vm3, %v1163_v21, %v1164_v13  ;;  %v1663_v13 = vld [vmem:[%s3242_s7 + $0x68] sm:$0xff] }
 0x818   :  { %v3079_v24 = vsel %vm202_vm3, %v1242_v22, %v1241_v18  ;;  %v1243_v48 = vsel %vm202_vm3, %v1241_v18, %v1242_v22  ;;  %v1662_v21 = vld [vmem:[%s3242_s7 + $0x60] sm:$0xff]  ;;  %v1664_v22 = vld [vmem:[%s3242_s7 + $0x70] sm:$0xff] }
 0x819   :  { %v2614_v18 = vpack.c.bf16 %v1663_v13, %v1662_v21 }
 0x81a   :  { %v1011_v26 = vld [vmem:[#allocation4 + $0x38] sm:$0xff] }
 0x81b   :  { %v1012_v27 = vsel %vm202_vm3, %v1010_v25, %v1011_v26  ;;  %v1086_v29 = vld [vmem:[#allocation4 + $0x30] sm:$0xff]  ;;  %v3083_v30 = vsel %vm202_vm3, %v1011_v26, %v1010_v25 }
 0x81c   :  { %v1083_v31 = vadd.f32 %v1079_v61, %v1012_v27  ;;  %v3086_v32 = vsel %vm202_vm3, %v1086_v29, %v1085_v28  ;;  %v1087_v34 = vsel %vm202_vm3, %v1085_v28, %v1086_v29 }
 0x81e   :  { %2643 = vtanh.f32 %v1083_v31 }
 0x828   :  { %v2644_v33 = vpop.eup %2643 }
 0x829   :  { %2232 = vmatmul.mubr.msk.f32.vlgmr.msra.gmra.mrb[24].mxu1 %vm183_vm2, %v2644_v33 }
 0x82a   :  { %2537 = vmatpush3.bf16.msra.mxu1 %v2992_v38  ;;  %2269 = vmatprep.mubr.msk.f32.mxu1 %vm2686_vm1, %v2687_v7 }
 0x82b   :  { %2538 = vmatprep.subr.bf16.mxu1 %v2685_v4 }
 0x82e   :  { %2540 = vmatpush3.bf16.msra.mxu1 %v3002_v41 }
 0x82f   :  { %2541 = vmatprep.subr.bf16.mxu1 %v2685_v4 }
 0x832   :  { %2543 = vmatpush3.bf16.msra.mxu1 %v3015_v45 }
 0x833   :  { %2544 = vmatprep.subr.bf16.mxu1 %v2685_v4 }
 0x836   :  { %2546 = vmatpush3.bf16.msra.mxu1 %v3021_v47 }
 0x837   :  { %2559 = vmatprep.subr.bf16.mxu1 %v2685_v4 }
 0x8fc   :  { %v1157_v35 = vpop.f32.mrb[24].mxu1 }
 0x8fd   :  { %v1161_v36 = vadd.f32 %v1157_v35, %v1087_v34  ;;  %v2233_v37 = vpop.f32.mrb[25].mxu1  ;;  %v1746_v35 = vld [vmem:[%s3244_s9] sm:$0x3] }
 0x8ff   :  { %2645 = vtanh.f32 %v1161_v36 }
 0x909   :  { %v2646_v39 = vpop.eup %2645 }
 0x90a   :  { %2251 = vmatmul.mubr.msk.f32.vlgmr.msra.gmra.mrb[10].mxu0 %vm183_vm2, %v2646_v39 }
 0x90b   :  { %2549 = vmatpush3.bf16.msra.mxu0 %v2992_v38  ;;  %2288 = vmatprep.mubr.msk.f32.mxu0 %vm2686_vm1, %v2687_v7 }
 0x90c   :  { %2550 = vmatprep.subr.bf16.mxu0 %v2685_v4 }
 0x90f   :  { %2552 = vmatpush3.bf16.msra.mxu0 %v3002_v41 }
 0x910   :  { %2553 = vmatprep.subr.bf16.mxu0 %v2685_v4 }
 0x913   :  { %2555 = vmatpush3.bf16.msra.mxu0 %v3015_v45 }
 0x914   :  { %2556 = vmatprep.subr.bf16.mxu0 %v2685_v4 }
 0x917   :  { %2558 = vmatpush3.bf16.msra.mxu0 %v3021_v47 }
 0x918   :  { %2571 = vmatprep.subr.bf16.mxu0 %v2685_v4 }
 0x9dd   :  { %v1235_v42 = vpop.f32.mrb[10].mxu0 }
 0x9de   :  { %v1239_v43 = vadd.f32 %v1235_v42, %v1165_v40  ;;  %v2252_v44 = vpop.f32.mrb[11].mxu0 }
 0x9e0   :  { %2647 = vtanh.f32 %v1239_v43 }
 0x9ea   :  { %v2648_v46 = vpop.eup %2647 }
 0x9eb   :  { %2270 = vmatmul.mubr.msk.f32.vlgmr.msra.gmra.mrb[26].mxu1 %vm183_vm2, %v2648_v46 }
 0x9ec   :  { %2561 = vmatpush3.bf16.msra.mxu1 %v2992_v38  ;;  %2307 = vmatprep.mubr.msk.f32.mxu1 %vm2686_vm1, %v2687_v7 }
 0x9ed   :  { %2562 = vmatprep.subr.bf16.mxu1 %v2685_v4 }
 0x9f0   :  { %2564 = vmatpush3.bf16.msra.mxu1 %v3002_v41 }
 0x9f1   :  { %2565 = vmatprep.subr.bf16.mxu1 %v2685_v4 }
 0x9f4   :  { %2567 = vmatpush3.bf16.msra.mxu1 %v3015_v45 }
 0x9f5   :  { %2568 = vmatprep.subr.bf16.mxu1 %v2685_v4 }
 0x9f8   :  { %2570 = vmatpush3.bf16.msra.mxu1 %v3021_v47 }
 0x9f9   :  { %2583 = vmatprep.subr.bf16.mxu1 %v2685_v4 }
 0xabe   :  { %v1313_v49 = vpop.f32.mrb[26].mxu1 }
 0xabf   :  { %v1317_v50 = vadd.f32 %v1313_v49, %v1243_v48  ;;  %v2271_v51 = vpop.f32.mrb[27].mxu1 }
 0xac1   :  { %2649 = vtanh.f32 %v1317_v50 }
 0xacb   :  { %v2650_v52 = vpop.eup %2649 }
 0xacc   :  { %2289 = vmatmul.mubr.msk.f32.vlgmr.msra.gmra.mrb[12].mxu0 %vm183_vm2, %v2650_v52 }
 0xacd   :  { %2573 = vmatpush3.bf16.msra.mxu0 %v2992_v38  ;;  %2326 = vmatprep.mubr.msk.f32.mxu0 %vm2686_vm1, %v2687_v7 }
 0xace   :  { %2574 = vmatprep.subr.bf16.mxu0 %v2685_v4 }
 0xad1   :  { %2576 = vmatpush3.bf16.msra.mxu0 %v3002_v41 }
 0xad2   :  { %2577 = vmatprep.subr.bf16.mxu0 %v2685_v4 }
 0xad5   :  { %2579 = vmatpush3.bf16.msra.mxu0 %v3015_v45 }
 0xad6   :  { %2580 = vmatprep.subr.bf16.mxu0 %v2685_v4 }
 0xad9   :  { %2582 = vmatpush3.bf16.msra.mxu0 %v3021_v47 }
 0xada   :  { %2595 = vmatprep.subr.bf16.mxu0 %v2685_v4 }
 0xb9f   :  { %v1389_v53 = vpop.f32.mrb[12].mxu0 }
 0xba0   :  { %v1393_v54 = vadd.f32 %v1389_v53, %v3079_v24  ;;  %v2290_v55 = vpop.f32.mrb[13].mxu0 }
 0xba2   :  { %2651 = vtanh.f32 %v1393_v54 }
 0xbac   :  { %v2652_v56 = vpop.eup %2651 }
 0xbad   :  { %2308 = vmatmul.mubr.msk.f32.vlgmr.msra.gmra.mrb[28].mxu1 %vm183_vm2, %v2652_v56 }
 0xbae   :  { %2585 = vmatpush3.bf16.msra.mxu1 %v2992_v38  ;;  %2345 = vmatprep.mubr.msk.f32.mxu1 %vm2686_vm1, %v2687_v7 }
 0xbaf   :  { %2586 = vmatprep.subr.bf16.mxu1 %v2685_v4 }
 0xbb2   :  { %2588 = vmatpush3.bf16.msra.mxu1 %v3002_v41 }
 0xbb3   :  { %2589 = vmatprep.subr.bf16.mxu1 %v2685_v4 }
 0xbb6   :  { %2591 = vmatpush3.bf16.msra.mxu1 %v3015_v45 }
 0xbb7   :  { %2592 = vmatprep.subr.bf16.mxu1 %v2685_v4 }
 0xbba   :  { %2594 = vmatpush3.bf16.msra.mxu1 %v3021_v47  ;;  %v1650_v47 = vld [vmem:[%s3242_s7] sm:$0xff] }
 0xbbb   :  { %v2596_v63 = vpack.c.bf16 %v1651_v62, %v1650_v47 }
 0xc80   :  { %v1465_v57 = vpop.f32.mrb[28].mxu1 }
 0xc81   :  { %v1469_v58 = vadd.f32 %v1465_v57, %v3076_v23  ;;  %v2309_v59 = vpop.f32.mrb[29].mxu1  ;;  %v1665_v23 = vld [vmem:[%s3242_s7 + $0x78] sm:$0xff] }
 0xc82   :  { %v2617_v24 = vpack.c.bf16 %v1665_v23, %v1664_v22 }
 0xc83   :  { %2653 = vtanh.f32 %v1469_v58 }
 0xc8d   :  { %v2654_v38 = vpop.eup %2653 }
 0xc8e   :  { %2327 = vmatmul.mubr.msk.f32.vlgmr.msra.gmra.mrb[14].mxu0 %vm183_vm2, %v2654_v38 }
 0xc8f   :  { %2380 = vmatprep.mubr.msk.f32.mxu0 %vm2686_vm1, %v2687_v7  ;;  %v1652_v7 = vld [vmem:[%s3242_s7 + $0x10] sm:$0xff]  ;;  %2597 = vmatpush3.bf16.msra.mxu0 %v2596_v63 }
 0xc90   :  { %v2599_v1 = vpack.c.bf16 %v1653_v0, %v1652_v7  ;;  %2598 = vmatprep.subr.bf16.mxu0 %v2685_v4 }
 0xc93   :  { %2600 = vmatpush3.bf16.msra.mxu0 %v2599_v1 }
 0xc94   :  { %2601 = vmatprep.subr.bf16.mxu0 %v2685_v4 }
 0xc97   :  { %2603 = vmatpush3.bf16.msra.mxu0 %v2602_v5 }
 0xc98   :  { %2604 = vmatprep.subr.bf16.mxu0 %v2685_v4 }
 0xc9b   :  { %2606 = vmatpush3.bf16.msra.mxu0 %v2605_v10 }
 0xc9c   :  { %2607 = vmatprep.subr.bf16.mxu0 %v2685_v4 }
 0xc9f   :  { %2609 = vmatpush3.bf16.msra.mxu0 %v2608_v14 }
 0xca0   :  { %2610 = vmatprep.subr.bf16.mxu0 %v2685_v4 }
 0xca3   :  { %2612 = vmatpush3.bf16.msra.mxu0 %v2611_v17 }
 0xca4   :  { %2613 = vmatprep.subr.bf16.mxu0 %v2685_v4 }
 0xca7   :  { %2615 = vmatpush3.bf16.msra.mxu0 %v2614_v18 }
 0xca8   :  { %2616 = vmatprep.subr.bf16.mxu0 %v2685_v4  ;;  %v1812_v4 = vld [vmem:[%s3243_s8] ss:$0 sm:$0xff]  ;;  %s2692_s8 = smov [#allocation6]  }
 0xca9   :  { %s1772_s4 = sshll.u32 %s2692_s8, 4  ;;  %s1773_s4 = int_to_ptr.vmem [resolvable:$true] %s1772_s4 }
 0xcaa   :  { %p2666_p1 = scmp.lt.s32.totalorder %s1773_s4, %s1773_s4 }
 0xcab   :  { %2618 = vmatpush3.bf16.msra.mxu0 %v2617_v24 }
 0xd61   :  { %v1541_v41 = vpop.f32.mrb[14].mxu0 }
 0xd62   :  { %v1545_v60 = vadd.f32 %v1541_v41, %v3086_v32  ;;  %v2328_v61 = vpop.f32.mrb[15].mxu0 }
 0xd64   :  { %2655 = vtanh.f32 %v1545_v60 }
 0xd6e   :  { %v2656_v45 = vpop.eup %2655 }
 0xd6f   :  { %2346 = vmatmul.mubr.msk.f32.vlgmr.msra.gmra.mrb[30].mxu1 %vm183_vm2, %v2656_v45 }
 0xe42   :  { %v1617_v19 = vpop.f32.mrb[30].mxu1 }
 0xe43   :  { %v1621_v8 = vadd.f32 %v1617_v19, %v3083_v30  ;;  %v2347_v20 = vpop.f32.mrb[31].mxu1 }
 0xe45   :  { %2657 = vtanh.f32 %v1621_v8 }
 0xe4f   :  { %v2658_v25 = vpop.eup %2657 }
 0xe50   :  { %1638 = vst.msk [vmem:[#allocation5 + $0x1] sm:$0x1] %vm1623_vm5, %v2658_v25  ;;  %1645 = vrot.lane.b32.xlu1 %v2658_v25, %s2688_s5  ;;  %1640 = vrot.lane.b32.xlu0 %v2658_v25, %s2689_s13  ;;  %s2690_s5 = smov 16  }
 0xec2   :  { %v1641_v26 = vpop.permute.xlu0 %1640  ;;  %v1646_v27 = vpop.permute.xlu1 %1645 }
 0xec3   :  { %1643 = vst.msk [vmem:[#allocation5] sm:$0x2] %vm1629_vm6, %v1641_v26 }
 0xec4   :  { %1644 = vst.msk [vmem:[#allocation5 + $0x1] sm:$0x1] %vm1631_vm7, %v1641_v26 }
 0xec5   :  { %1648 = vst.msk [vmem:[#allocation5] sm:$0x2] %vm1636_vm8, %v1646_v27 }
 0xecc   :  { %v1649_v28 = vld [vmem:[#allocation5] sm:$0x3] }
 0xecd   :  { %2381 = vmatmul.mubr.f32.vlgmr.msra.gmra.mrb[16].mxu0 %v1649_v28 }
 0xfa0   :  { %v1739_v29 = vpop.f32.mrb[16].mxu0 }
 0xfa1   :  { %v1740_v30 = vadd.f32 %v1812_v4, %v1739_v29  ;;  %v2382_v31 = vpop.f32.mrb[17].mxu0 }
 0xfa3   :  { %v1743_v32 = vmul.f32 0.5, %v1740_v30  ;;  %1754 = vrot.lane.b32.xlu1 %v1740_v30, %s2690_s5 }
 0xfa5   :  { %v1744_v33 = vmul.f32 1.442695, %v1743_v32 }
 0xfa7   :  { %2659 = vpow2.f32 %v1744_v33 }
 0xfb1   :  { %v2660_v34 = vpop.eup %2659 }
 0xfb2   :  { %1748 = vrot.lane.b32.xlu0 %v2660_v34, %s2691_s1 }
 0xfb6   :  { %1757 = vrot.lane.b32.xlu0 %v2660_v34, %s2689_s13  ;;  %s2661_s13 = scalar_lea.vmem %s1773_s4, 32 }
 0xfb7   :  { %p2662_p0 = scmp.ne.s32.totalorder %s1773_s4, %s2661_s13  ;;  %p2667_p2 = scmp.lt.s32.totalorder %s2661_s13, %s2661_s13 }
 0xfb9   :  { %p2668_p3 = por %p2667_p2, %p2666_p1 }
 0xfbb   :  { %p2669_p4 = pnand %p2668_p3, %p2662_p0 }
0x1015   :  { %v1755_v40 = vpop.permute.xlu1 %1754 }
0x1024   :  { %v1749_v36 = vpop.permute.xlu0 %1748 }
0x1025   :  { %v1751_v37 = vmul.f32 %v1749_v36, %v1746_v35 }
0x1027   :  { %v1752_v39 = vadd.f32 %v1751_v37, %v1740_v30 }
0x1028   :  { %v1758_v44 = vpop.permute.xlu0 %1757 }
0x1029   :  { %v1760_v42 = vsel %vm53_vm0, %v1752_v39, %v1755_v40 }
0x102a   :  { %v1761_v43 = vsel %vm202_vm3, %v1760_v42, %v1755_v40 }
0x102b   :  { %v1763_v46 = vsel %vm1762_vm9, %v1761_v43, %v1758_v44 }
0x102c   :  { %1765 = vst.msk [vmem:[#allocation6] sm:$0x3] %vm1764_vm10, %v1763_v46 }
0x102d   :  { %2672 = shalt.err (!%p2669_p4)
}
0x102e   :  { %s2673_s26 = scalar_lea.hbm %s3245_s10, 32 }
0x102f   :  { %p2674_p5 = scmp.ne.s32.totalorder %s3245_s10, %s2673_s26  ;;  %p2677_p6 = scmp.lt.u32.totalorder %s2673_s26, %s3245_s10 }
0x1031   :  { %p2679_p7 = pnand %p2677_p6, %p2674_p5 }
0x1033   :  { %2682 = shalt.err (!%p2679_p7)
}
0x1034   :  { %1775 = dma.vmem_to_hbm [thread:$0]  %s1773_s4, 32, %s3245_s10, [#allocation7]  }
0x1035   :  { %2683 = dma.done.wait [#allocation7], 32  }
0x1036   :  { %2684 = vsyncadd [#allocation7], 4294967264 }
0x1037   :  { %1779 = vsyncpa [#allocation7], 1 }

</bundles_post_ra>
